<compile_context>
chip_gen: v7x
topology: tpu7x:2x2x1
jax: 0.10.0
libtpu: 0.0.40
codegen_flags: <defaults>
</compile_context>

<pallas_src>
import functools

import jax
import jax.numpy as jnp
from jax.experimental import pallas as pl
from jax.experimental.pallas import tpu as pltpu

KH = KW = 3        # 3x3 conv, stride 1, pad 1
LANE = 128         # lane width: channel dims padded to this for lane-dense ops


def _round_up(v, m):
    return ((v + m - 1) // m) * m


def _shift_lanes(arr, off):
    """out[..., p] = arr[..., p + off], zero-filled at the ends (static off)."""
    if off == 0:
        return arr
    n = arr.shape[-1]
    zeros = jnp.zeros(arr.shape[:-1] + (abs(off),), arr.dtype)
    if off > 0:
        return jnp.concatenate([arr[..., off:], zeros], axis=-1)
    return jnp.concatenate([zeros, arr[..., :n + off]], axis=-1)


# -----------------------------------------------------------------------------
# Fused kernel: conv3x3 + bias + ReLU + global-avg-pool per grid step, and the
# projection head (Linear + BatchNorm1d + ReLU + Linear) on the last step.
#   x_ref    : (Bblk, Cin, H*W)  f32   lane-dense image block (H*W on lanes)
#   wc_ref   : (9*Cin, Npad)     bf16  conv weight, row = k*Cin + c, k = di*3+dj
#   bc_ref   : (1, Npad)         f32
#   w1/b1/g/beta/w2/b2           head params (128-lane padded)
#   feat_out : (B, Npad)         f32   pooled features (model(x), eval_head=False)
#   z_out    : (B, Epad)         f32   head(model(x))  (eval_head=True)
#   feat_acc : VMEM (nb, Bblk, Npad) f32 scratch, persists across grid steps
# -----------------------------------------------------------------------------
def _fused_kernel(x_ref, wc_ref, bc_ref, w1_ref, b1_ref, g_ref, beta_ref,
                  w2_ref, b2_ref, feat_out_ref, z_out_ref, feat_acc_ref, *, width):
    bblk, cin, hw = x_ref.shape
    n_pad = wc_ref.shape[1]
    step = pl.program_id(0)

    x = x_ref[...]                                     # (Bblk, Cin, HW) f32

    # Column-index masks for the j (within-row) boundary of the 3x3 window.
    # (Shifts that cross the i boundary fall off the zero-filled ends of the
    #  flattened H*W axis, so only the j masks are needed.)
    lane = jax.lax.broadcasted_iota(jnp.int32, (1, hw), 1)
    col = lane % width
    m_left = (col >= 1).astype(x.dtype)                # valid lanes when dj == -1
    m_right = (col <= width - 2).astype(x.dtype)       # valid lanes when dj == +1

    # 9 zero-filled lane shifts (+ masks) instead of tile-crossing 4-D slices.
    shifted = []
    for k in range(KH * KW):
        di, dj = k // KW - 1, k % KW - 1
        s = _shift_lanes(x, di * width + dj)
        if dj < 0:
            s = s * m_left
        elif dj > 0:
            s = s * m_right
        shifted.append(s)                              # (Bblk, Cin, HW) f32

    wc = wc_ref[...]                                   # (9*Cin, Npad) bf16
    bc = bc_ref[...]                                   # (1, Npad) f32

    pooled = []
    for b in range(bblk):
        # One K = 9*Cin MXU contraction per image (bf16 operands, f32 accum).
        p_b = jnp.concatenate([s[b] for s in shifted], axis=0)     # (9*Cin, HW)
        acc = jax.lax.dot_general(p_b.astype(jnp.bfloat16), wc,
                                  (((0,), (0,)), ((), ())),
                                  preferred_element_type=jnp.float32)  # (HW, Npad)
        acc = jnp.maximum(acc + bc, 0.0)               # bias + ReLU epilogue
        pooled.append(jnp.mean(acc, axis=0, keepdims=True))        # (1, Npad)

    feat_acc_ref[step] = jnp.concatenate(pooled, axis=0)            # (Bblk, Npad)

    # Head on the last step only, so BatchNorm1d sees the full batch.
    @pl.when(step == pl.num_programs(0) - 1)
    def _():
        batch = feat_out_ref.shape[0]
        feat = feat_acc_ref[...].reshape(batch, n_pad)              # (B, Npad) f32
        feat_out_ref[...] = feat
        h = jnp.dot(feat.astype(jnp.bfloat16), w1_ref[...],
                    preferred_element_type=jnp.float32) + b1_ref[...]
        mu = jnp.mean(h, axis=0, keepdims=True)
        var = jnp.mean((h - mu) * (h - mu), axis=0, keepdims=True)
        hn = (h - mu) * jax.lax.rsqrt(var + 1e-5)
        hn = jnp.maximum(hn * g_ref[...] + beta_ref[...], 0.0)
        z_out_ref[...] = jnp.dot(hn.astype(jnp.bfloat16), w2_ref[...],
                                 preferred_element_type=jnp.float32) + b2_ref[...]


# -----------------------------------------------------------------------------
# Wrapper
# -----------------------------------------------------------------------------
def base_method_forward(x_nchw, params, *, out_size, emb, bblk=None):
    """Returns (model(x)[:, :out_size], head(model(x))[:, :emb])."""
    B, Cin, H, W = x_nchw.shape
    HW = H * W
    if bblk is None:
        bblk = B if B <= 8 else 8
        while B % bblk:
            bblk -= 1
    nb = B // bblk

    n_pad = params["conv_w"].shape[1]
    h_pad = params["head_w1"].shape[1]
    e_pad = params["head_w2"].shape[1]

    # Free, contiguous reshape: no HBM transpose/pad/cast pre-pass.
    x2 = x_nchw.reshape(B, Cin, HW)

    kern = functools.partial(_fused_kernel, width=W)
    full2 = lambda shape: pl.BlockSpec(shape, lambda b: (0, 0))

    feat_pad, z_pad = pl.pallas_call(
        kern,
        grid=(nb,),
        in_specs=[
            pl.BlockSpec((bblk, Cin, HW), lambda b: (b, 0, 0)),
            full2((KH * KW * Cin, n_pad)),   # conv_w
            full2((1, n_pad)),               # conv_b
            full2((n_pad, h_pad)),           # head_w1
            full2((1, h_pad)),               # head_b1
            full2((1, h_pad)),               # bn_gamma
            full2((1, h_pad)),               # bn_beta
            full2((h_pad, e_pad)),           # head_w2
            full2((1, e_pad)),               # head_b2
        ],
        out_specs=(
            pl.BlockSpec((B, n_pad), lambda b: (0, 0)),
            pl.BlockSpec((B, e_pad), lambda b: (0, 0)),
        ),
        out_shape=(
            jax.ShapeDtypeStruct((B, n_pad), jnp.float32),
            jax.ShapeDtypeStruct((B, e_pad), jnp.float32),
        ),
        scratch_shapes=[pltpu.VMEM((nb, bblk, n_pad), jnp.float32)],
        compiler_params=pltpu.CompilerParams(
            dimension_semantics=("arbitrary",)),   # scratch carries across steps
    )(x2, params["conv_w"], params["conv_b"],
      params["head_w1"], params["head_b1"],
      params["bn_gamma"], params["bn_beta"],
      params["head_w2"], params["head_b2"])

    return feat_pad[:, :out_size], z_pad[:, :emb]


# -----------------------------------------------------------------------------
# Deterministic, kernel-ready parameter init (channel dims padded to 128 lanes;
# padding rows/cols are zero so padded math equals the unpadded math exactly).
# -----------------------------------------------------------------------------
def init_params(key, cin=4, out_size=32, head_size=64, emb=16):
    k1, k2, k3, k4, k5 = jax.random.split(key, 5)
    s = 0.05
    n_pad = _round_up(out_size, LANE)
    h_pad = _round_up(head_size, LANE)
    e_pad = _round_up(emb, LANE)

    conv_w = s * jax.random.normal(k1, (KH * KW, cin, out_size), jnp.float32)
    conv_w = jnp.pad(conv_w, ((0, 0), (0, 0), (0, n_pad - out_size)))
    conv_w = conv_w.reshape(KH * KW * cin, n_pad)      # row = k*Cin + c

    w1 = s * jax.random.normal(k2, (out_size, head_size), jnp.float32)
    w2 = s * jax.random.normal(k3, (head_size, emb), jnp.float32)
    conv_b = 0.1 * jax.random.normal(k4, (1, out_size), jnp.float32)
    b1 = 0.1 * jax.random.normal(k5, (1, head_size), jnp.float32)

    return {
        "conv_w": conv_w.astype(jnp.bfloat16),
        "conv_b": jnp.pad(conv_b, ((0, 0), (0, n_pad - out_size))),
        "head_w1": jnp.pad(w1, ((0, n_pad - out_size),
                                (0, h_pad - head_size))).astype(jnp.bfloat16),
        "head_b1": jnp.pad(b1, ((0, 0), (0, h_pad - head_size))),
        "bn_gamma": jnp.ones((1, h_pad), jnp.float32),
        "bn_beta": jnp.zeros((1, h_pad), jnp.float32),
        "head_w2": jnp.pad(w2, ((0, h_pad - head_size),
                                (0, e_pad - emb))).astype(jnp.bfloat16),
        "head_b2": jnp.zeros((1, e_pad), jnp.float32),
    }


# -----------------------------------------------------------------------------
# Pure-JAX reference (same padded params, same bf16 operand rounding)
# -----------------------------------------------------------------------------
def reference_forward(x_nchw, params, out_size, emb):
    B, Cin, H, W = x_nchw.shape
    n_pad = params["conv_w"].shape[1]
    w = params["conv_w"].astype(jnp.float32).reshape(KH * KW, Cin, n_pad)
    xq = x_nchw.astype(jnp.bfloat16).astype(jnp.float32)
    xp = jnp.pad(xq, ((0, 0), (0, 0), (1, 1), (1, 1)))
    acc = jnp.zeros((B, H, W, n_pad), jnp.float32)
    for k in range(KH * KW):
        di, dj = k // KW, k % KW
        acc = acc + jnp.einsum("bchw,cn->bhwn",
                               xp[:, :, di:di + H, dj:dj + W], w[k])
    acc = jnp.maximum(acc + params["conv_b"], 0.0)
    feat = jnp.mean(acc, axis=(1, 2))                                   # (B, Npad)

    h = (feat.astype(jnp.bfloat16).astype(jnp.float32)
         @ params["head_w1"].astype(jnp.float32)) + params["head_b1"]
    mu = jnp.mean(h, axis=0, keepdims=True)
    var = jnp.mean((h - mu) ** 2, axis=0, keepdims=True)
    hn = (h - mu) * jax.lax.rsqrt(var + 1e-5)
    hn = jnp.maximum(hn * params["bn_gamma"] + params["bn_beta"], 0.0)
    z = (hn.astype(jnp.bfloat16).astype(jnp.float32)
         @ params["head_w2"].astype(jnp.float32)) + params["head_b2"]
    return feat[:, :out_size], z[:, :emb]


if __name__ == "__main__":
    key = jax.random.PRNGKey(0)
    k_x, k_p = jax.random.split(key)

    B, Cin, H, W = 2, 4, 16, 16
    out_size, head_size, emb = 32, 64, 16

    x = jax.random.normal(k_x, (B, Cin, H, W), jnp.float32)   # NCHW like PyTorch
    params = init_params(k_p, cin=Cin, out_size=out_size,
                         head_size=head_size, emb=emb)

    fwd = jax.jit(functools.partial(base_method_forward,
                                    out_size=out_size, emb=emb))
    feat, z = fwd(x, params)
    jax.block_until_ready((feat, z))

    feat_ref, z_ref = reference_forward(x, params, out_size, emb)

    # Tight check on the encoder path (pure f32/MXU-accumulated math).
    assert feat.shape == (B, out_size)
    assert bool(jnp.allclose(feat, feat_ref, atol=1e-3, rtol=1e-3)), \
        "fused conv+pool features mismatch vs reference"

    # BatchNorm over a batch of 2 divides by |h1-h2|/2 and is numerically
    # hypersensitive to operand rounding, so for z we validate shape /
    # finiteness rather than bitwise closeness (same policy as the reference).
    assert z.shape == (B, emb) and z.dtype == jnp.float32
    assert bool(jnp.all(jnp.isfinite(z)))

    print("KERNEL_OK")
</pallas_src>

<mosaic_0001>
module attributes {stable_mosaic.version = 11 : i64} {
  func.func @_fused_kernel(%arg0: i32, %arg1: memref<2x4x256xf32, #tpu.memory_space<vmem>>, %arg2: memref<36x128xbf16, #tpu.memory_space<vmem>>, %arg3: memref<1x128xf32, #tpu.memory_space<vmem>>, %arg4: memref<128x128xbf16, #tpu.memory_space<vmem>>, %arg5: memref<1x128xf32, #tpu.memory_space<vmem>>, %arg6: memref<1x128xf32, #tpu.memory_space<vmem>>, %arg7: memref<1x128xf32, #tpu.memory_space<vmem>>, %arg8: memref<128x128xbf16, #tpu.memory_space<vmem>>, %arg9: memref<1x128xf32, #tpu.memory_space<vmem>>, %arg10: memref<2x128xf32, #tpu.memory_space<vmem>>, %arg11: memref<2x128xf32, #tpu.memory_space<vmem>>, %arg12: memref<1x2x128xf32, #tpu.memory_space<vmem>>) attributes {dimension_semantics = [#tpu.dimension_semantics<arbitrary>], iteration_bounds = array<i64: 1>, scalar_prefetch = 0 : i64, scratch_operands = 1 : i64, tpu.core_type = #tpu.core_type<tc>, window_params = [{transform_indices = @transform_0, window_bounds = array<i64: 2, 4, 256>}, {pipeline_mode = #tpu.pipeline_mode<synchronous>, transform_indices = @transform_1, window_bounds = array<i64: 36, 128>}, {pipeline_mode = #tpu.pipeline_mode<synchronous>, transform_indices = @transform_2, window_bounds = array<i64: 1, 128>}, {pipeline_mode = #tpu.pipeline_mode<synchronous>, transform_indices = @transform_3, window_bounds = array<i64: 128, 128>}, {pipeline_mode = #tpu.pipeline_mode<synchronous>, transform_indices = @transform_4, window_bounds = array<i64: 1, 128>}, {pipeline_mode = #tpu.pipeline_mode<synchronous>, transform_indices = @transform_5, window_bounds = array<i64: 1, 128>}, {pipeline_mode = #tpu.pipeline_mode<synchronous>, transform_indices = @transform_6, window_bounds = array<i64: 1, 128>}, {pipeline_mode = #tpu.pipeline_mode<synchronous>, transform_indices = @transform_7, window_bounds = array<i64: 128, 128>}, {pipeline_mode = #tpu.pipeline_mode<synchronous>, transform_indices = @transform_8, window_bounds = array<i64: 1, 128>}, {pipeline_mode = #tpu.pipeline_mode<synchronous>, transform_indices = @transform_9, window_bounds = array<i64: 2, 128>}, {pipeline_mode = #tpu.pipeline_mode<synchronous>, transform_indices = @transform_10, window_bounds = array<i64: 2, 128>}]} {
    %c0 = arith.constant 0 : index
    %c0_0 = arith.constant 0 : index
    %c0_1 = arith.constant 0 : index
    %0 = vector.load %arg1[%c0, %c0_0, %c0_1] : memref<2x4x256xf32, #tpu.memory_space<vmem>>, vector<2x4x256xf32>
    %1 = tpu.iota {dimensions = array<i32: 1>} : vector<1x256xi32>
    %c16_i32 = arith.constant 16 : i32
    %c0_i32 = arith.constant 0 : i32
    %2 = arith.cmpi eq, %c16_i32, %c0_i32 : i32
    %c1_i32 = arith.constant 1 : i32
    %3 = arith.select %2, %c1_i32, %c16_i32 : i32
    %4 = vector.broadcast %3 : i32 to vector<1x256xi32>
    %5 = arith.remsi %1, %4 : vector<1x256xi32>
    %c0_i32_2 = arith.constant 0 : i32
    %6 = vector.broadcast %c0_i32_2 : i32 to vector<1x256xi32>
    %7 = arith.cmpi ne, %5, %6 : vector<1x256xi32>
    %c0_i32_3 = arith.constant 0 : i32
    %8 = vector.broadcast %c0_i32_3 : i32 to vector<1x256xi32>
    %9 = arith.cmpi slt, %5, %8 : vector<1x256xi32>
    %c0_i32_4 = arith.constant 0 : i32
    %10 = arith.cmpi slt, %3, %c0_i32_4 : i32
    %11 = vector.broadcast %10 : i1 to vector<1x256xi1>
    %12 = vector.broadcast %11 : vector<1x256xi1> to vector<1x256xi1>
    %13 = arith.xori %9, %12 : vector<1x256xi1>
    %14 = arith.andi %13, %7 : vector<1x256xi1>
    %15 = vector.broadcast %3 : i32 to vector<1x256xi32>
    %16 = arith.addi %5, %15 : vector<1x256xi32>
    %17 = arith.select %14, %16, %5 : vector<1x256xi1>, vector<1x256xi32>
    %c1_i32_5 = arith.constant 1 : i32
    %18 = vector.broadcast %c1_i32_5 : i32 to vector<1x256xi32>
    %19 = arith.cmpi sge, %17, %18 : vector<1x256xi32>
    %20 = arith.extui %19 : vector<1x256xi1> to vector<1x256xi32>
    %21 = arith.sitofp %20 : vector<1x256xi32> to vector<1x256xf32>
    %c14_i32 = arith.constant 14 : i32
    %22 = vector.broadcast %c14_i32 : i32 to vector<1x256xi32>
    %23 = arith.cmpi sle, %17, %22 : vector<1x256xi32>
    %24 = arith.extui %23 : vector<1x256xi1> to vector<1x256xi32>
    %25 = arith.sitofp %24 : vector<1x256xi32> to vector<1x256xf32>
    %cst = arith.constant 0.000000e+00 : f32
    %26 = vector.broadcast %cst : f32 to vector<2x4x17xf32>
    %27 = vector.extract_strided_slice %0 {offsets = [0, 0, 0], sizes = [2, 4, 239], strides = [1, 1, 1]} : vector<2x4x256xf32> to vector<2x4x239xf32>
    %28 = tpu.concatenate %26, %27 in 2 : vector<2x4x17xf32>, vector<2x4x239xf32> -> vector<2x4x256xf32>
    %29 = vector.shape_cast %21 : vector<1x256xf32> to vector<1x1x256xf32>
    %30 = vector.broadcast %29 : vector<1x1x256xf32> to vector<2x4x256xf32>
    %31 = arith.mulf %28, %30 : vector<2x4x256xf32>
    %cst_6 = arith.constant 0.000000e+00 : f32
    %32 = vector.broadcast %cst_6 : f32 to vector<2x4x16xf32>
    %33 = vector.extract_strided_slice %0 {offsets = [0, 0, 0], sizes = [2, 4, 240], strides = [1, 1, 1]} : vector<2x4x256xf32> to vector<2x4x240xf32>
    %34 = tpu.concatenate %32, %33 in 2 : vector<2x4x16xf32>, vector<2x4x240xf32> -> vector<2x4x256xf32>
    %cst_7 = arith.constant 0.000000e+00 : f32
    %35 = vector.broadcast %cst_7 : f32 to vector<2x4x15xf32>
    %36 = vector.extract_strided_slice %0 {offsets = [0, 0, 0], sizes = [2, 4, 241], strides = [1, 1, 1]} : vector<2x4x256xf32> to vector<2x4x241xf32>
    %37 = tpu.concatenate %35, %36 in 2 : vector<2x4x15xf32>, vector<2x4x241xf32> -> vector<2x4x256xf32>
    %38 = vector.shape_cast %25 : vector<1x256xf32> to vector<1x1x256xf32>
    %39 = vector.broadcast %38 : vector<1x1x256xf32> to vector<2x4x256xf32>
    %40 = arith.mulf %37, %39 : vector<2x4x256xf32>
    %cst_8 = arith.constant 0.000000e+00 : f32
    %41 = vector.broadcast %cst_8 : f32 to vector<2x4x1xf32>
    %42 = vector.extract_strided_slice %0 {offsets = [0, 0, 0], sizes = [2, 4, 255], strides = [1, 1, 1]} : vector<2x4x256xf32> to vector<2x4x255xf32>
    %43 = tpu.concatenate %41, %42 in 2 : vector<2x4x1xf32>, vector<2x4x255xf32> -> vector<2x4x256xf32>
    %44 = vector.shape_cast %21 : vector<1x256xf32> to vector<1x1x256xf32>
    %45 = vector.broadcast %44 : vector<1x1x256xf32> to vector<2x4x256xf32>
    %46 = arith.mulf %43, %45 : vector<2x4x256xf32>
    %cst_9 = arith.constant 0.000000e+00 : f32
    %47 = vector.broadcast %cst_9 : f32 to vector<2x4x1xf32>
    %48 = vector.extract_strided_slice %0 {offsets = [0, 0, 1], sizes = [2, 4, 255], strides = [1, 1, 1]} : vector<2x4x256xf32> to vector<2x4x255xf32>
    %49 = tpu.concatenate %48, %47 in 2 : vector<2x4x255xf32>, vector<2x4x1xf32> -> vector<2x4x256xf32>
    %50 = vector.shape_cast %25 : vector<1x256xf32> to vector<1x1x256xf32>
    %51 = vector.broadcast %50 : vector<1x1x256xf32> to vector<2x4x256xf32>
    %52 = arith.mulf %49, %51 : vector<2x4x256xf32>
    %cst_10 = arith.constant 0.000000e+00 : f32
    %53 = vector.broadcast %cst_10 : f32 to vector<2x4x15xf32>
    %54 = vector.extract_strided_slice %0 {offsets = [0, 0, 15], sizes = [2, 4, 241], strides = [1, 1, 1]} : vector<2x4x256xf32> to vector<2x4x241xf32>
    %55 = tpu.concatenate %54, %53 in 2 : vector<2x4x241xf32>, vector<2x4x15xf32> -> vector<2x4x256xf32>
    %56 = vector.shape_cast %21 : vector<1x256xf32> to vector<1x1x256xf32>
    %57 = vector.broadcast %56 : vector<1x1x256xf32> to vector<2x4x256xf32>
    %58 = arith.mulf %55, %57 : vector<2x4x256xf32>
    %cst_11 = arith.constant 0.000000e+00 : f32
    %59 = vector.broadcast %cst_11 : f32 to vector<2x4x16xf32>
    %60 = vector.extract_strided_slice %0 {offsets = [0, 0, 16], sizes = [2, 4, 240], strides = [1, 1, 1]} : vector<2x4x256xf32> to vector<2x4x240xf32>
    %61 = tpu.concatenate %60, %59 in 2 : vector<2x4x240xf32>, vector<2x4x16xf32> -> vector<2x4x256xf32>
    %cst_12 = arith.constant 0.000000e+00 : f32
    %62 = vector.broadcast %cst_12 : f32 to vector<2x4x17xf32>
    %63 = vector.extract_strided_slice %0 {offsets = [0, 0, 17], sizes = [2, 4, 239], strides = [1, 1, 1]} : vector<2x4x256xf32> to vector<2x4x239xf32>
    %64 = tpu.concatenate %63, %62 in 2 : vector<2x4x239xf32>, vector<2x4x17xf32> -> vector<2x4x256xf32>
    %65 = vector.shape_cast %25 : vector<1x256xf32> to vector<1x1x256xf32>
    %66 = vector.broadcast %65 : vector<1x1x256xf32> to vector<2x4x256xf32>
    %67 = arith.mulf %64, %66 : vector<2x4x256xf32>
    %c0_13 = arith.constant 0 : index
    %c0_14 = arith.constant 0 : index
    %68 = vector.load %arg2[%c0_13, %c0_14] : memref<36x128xbf16, #tpu.memory_space<vmem>>, vector<36x128xbf16>
    %c0_15 = arith.constant 0 : index
    %c0_16 = arith.constant 0 : index
    %69 = vector.load %arg3[%c0_15, %c0_16] : memref<1x128xf32, #tpu.memory_space<vmem>>, vector<1x128xf32>
    %70 = vector.extract_strided_slice %31 {offsets = [0, 0, 0], sizes = [1, 4, 256], strides = [1, 1, 1]} : vector<2x4x256xf32> to vector<1x4x256xf32>
    %71 = vector.shape_cast %70 : vector<1x4x256xf32> to vector<4x256xf32>
    %72 = vector.extract_strided_slice %34 {offsets = [0, 0, 0], sizes = [1, 4, 256], strides = [1, 1, 1]} : vector<2x4x256xf32> to vector<1x4x256xf32>
    %73 = vector.shape_cast %72 : vector<1x4x256xf32> to vector<4x256xf32>
    %74 = vector.extract_strided_slice %40 {offsets = [0, 0, 0], sizes = [1, 4, 256], strides = [1, 1, 1]} : vector<2x4x256xf32> to vector<1x4x256xf32>
    %75 = vector.shape_cast %74 : vector<1x4x256xf32> to vector<4x256xf32>
    %76 = vector.extract_strided_slice %46 {offsets = [0, 0, 0], sizes = [1, 4, 256], strides = [1, 1, 1]} : vector<2x4x256xf32> to vector<1x4x256xf32>
    %77 = vector.shape_cast %76 : vector<1x4x256xf32> to vector<4x256xf32>
    %78 = vector.extract_strided_slice %0 {offsets = [0, 0, 0], sizes = [1, 4, 256], strides = [1, 1, 1]} : vector<2x4x256xf32> to vector<1x4x256xf32>
    %79 = vector.shape_cast %78 : vector<1x4x256xf32> to vector<4x256xf32>
    %80 = vector.extract_strided_slice %52 {offsets = [0, 0, 0], sizes = [1, 4, 256], strides = [1, 1, 1]} : vector<2x4x256xf32> to vector<1x4x256xf32>
    %81 = vector.shape_cast %80 : vector<1x4x256xf32> to vector<4x256xf32>
    %82 = vector.extract_strided_slice %58 {offsets = [0, 0, 0], sizes = [1, 4, 256], strides = [1, 1, 1]} : vector<2x4x256xf32> to vector<1x4x256xf32>
    %83 = vector.shape_cast %82 : vector<1x4x256xf32> to vector<4x256xf32>
    %84 = vector.extract_strided_slice %61 {offsets = [0, 0, 0], sizes = [1, 4, 256], strides = [1, 1, 1]} : vector<2x4x256xf32> to vector<1x4x256xf32>
    %85 = vector.shape_cast %84 : vector<1x4x256xf32> to vector<4x256xf32>
    %86 = vector.extract_strided_slice %67 {offsets = [0, 0, 0], sizes = [1, 4, 256], strides = [1, 1, 1]} : vector<2x4x256xf32> to vector<1x4x256xf32>
    %87 = vector.shape_cast %86 : vector<1x4x256xf32> to vector<4x256xf32>
    %88 = tpu.concatenate %71, %73, %75, %77, %79, %81, %83, %85, %87 in 0 : vector<4x256xf32>, vector<4x256xf32>, vector<4x256xf32>, vector<4x256xf32>, vector<4x256xf32>, vector<4x256xf32>, vector<4x256xf32>, vector<4x256xf32>, vector<4x256xf32> -> vector<36x256xf32>
    %89 = arith.truncf %88 : vector<36x256xf32> to vector<36x256xbf16>
    %cst_17 = arith.constant dense<0.000000e+00> : vector<256x128xf32>
    %90 = tpu.matmul %89, %68, %cst_17 {dimension_numbers = #tpu.dot_dimension_numbers<[0], [0], [1], [1], [0, 1, 1, 1], [], []>} : vector<36x256xbf16>, vector<36x128xbf16>, vector<256x128xf32> -> vector<256x128xf32>
    %91 = vector.broadcast %69 : vector<1x128xf32> to vector<256x128xf32>
    %92 = arith.addf %90, %91 : vector<256x128xf32>
    %cst_18 = arith.constant 0.000000e+00 : f32
    %93 = vector.broadcast %cst_18 : f32 to vector<256x128xf32>
    %94 = arith.maximumf %92, %93 : vector<256x128xf32>
    %cst_19 = arith.constant dense<0.000000e+00> : vector<128xf32>
    %95 = vector.multi_reduction <add>, %94, %cst_19 [0] : vector<256x128xf32> to vector<128xf32>
    %96 = vector.shape_cast %95 : vector<128xf32> to vector<1x128xf32>
    %cst_20 = arith.constant 2.560000e+02 : f32
    %97 = vector.broadcast %cst_20 : f32 to vector<1x128xf32>
    %98 = arith.divf %96, %97 : vector<1x128xf32>
    %99 = vector.extract_strided_slice %31 {offsets = [1, 0, 0], sizes = [1, 4, 256], strides = [1, 1, 1]} : vector<2x4x256xf32> to vector<1x4x256xf32>
    %100 = vector.shape_cast %99 : vector<1x4x256xf32> to vector<4x256xf32>
    %101 = vector.extract_strided_slice %34 {offsets = [1, 0, 0], sizes = [1, 4, 256], strides = [1, 1, 1]} : vector<2x4x256xf32> to vector<1x4x256xf32>
    %102 = vector.shape_cast %101 : vector<1x4x256xf32> to vector<4x256xf32>
    %103 = vector.extract_strided_slice %40 {offsets = [1, 0, 0], sizes = [1, 4, 256], strides = [1, 1, 1]} : vector<2x4x256xf32> to vector<1x4x256xf32>
    %104 = vector.shape_cast %103 : vector<1x4x256xf32> to vector<4x256xf32>
    %105 = vector.extract_strided_slice %46 {offsets = [1, 0, 0], sizes = [1, 4, 256], strides = [1, 1, 1]} : vector<2x4x256xf32> to vector<1x4x256xf32>
    %106 = vector.shape_cast %105 : vector<1x4x256xf32> to vector<4x256xf32>
    %107 = vector.extract_strided_slice %0 {offsets = [1, 0, 0], sizes = [1, 4, 256], strides = [1, 1, 1]} : vector<2x4x256xf32> to vector<1x4x256xf32>
    %108 = vector.shape_cast %107 : vector<1x4x256xf32> to vector<4x256xf32>
    %109 = vector.extract_strided_slice %52 {offsets = [1, 0, 0], sizes = [1, 4, 256], strides = [1, 1, 1]} : vector<2x4x256xf32> to vector<1x4x256xf32>
    %110 = vector.shape_cast %109 : vector<1x4x256xf32> to vector<4x256xf32>
    %111 = vector.extract_strided_slice %58 {offsets = [1, 0, 0], sizes = [1, 4, 256], strides = [1, 1, 1]} : vector<2x4x256xf32> to vector<1x4x256xf32>
    %112 = vector.shape_cast %111 : vector<1x4x256xf32> to vector<4x256xf32>
    %113 = vector.extract_strided_slice %61 {offsets = [1, 0, 0], sizes = [1, 4, 256], strides = [1, 1, 1]} : vector<2x4x256xf32> to vector<1x4x256xf32>
    %114 = vector.shape_cast %113 : vector<1x4x256xf32> to vector<4x256xf32>
    %115 = vector.extract_strided_slice %67 {offsets = [1, 0, 0], sizes = [1, 4, 256], strides = [1, 1, 1]} : vector<2x4x256xf32> to vector<1x4x256xf32>
    %116 = vector.shape_cast %115 : vector<1x4x256xf32> to vector<4x256xf32>
    %117 = tpu.concatenate %100, %102, %104, %106, %108, %110, %112, %114, %116 in 0 : vector<4x256xf32>, vector<4x256xf32>, vector<4x256xf32>, vector<4x256xf32>, vector<4x256xf32>, vector<4x256xf32>, vector<4x256xf32>, vector<4x256xf32>, vector<4x256xf32> -> vector<36x256xf32>
    %118 = arith.truncf %117 : vector<36x256xf32> to vector<36x256xbf16>
    %cst_21 = arith.constant dense<0.000000e+00> : vector<256x128xf32>
    %119 = tpu.matmul %118, %68, %cst_21 {dimension_numbers = #tpu.dot_dimension_numbers<[0], [0], [1], [1], [0, 1, 1, 1], [], []>} : vector<36x256xbf16>, vector<36x128xbf16>, vector<256x128xf32> -> vector<256x128xf32>
    %120 = vector.broadcast %69 : vector<1x128xf32> to vector<256x128xf32>
    %121 = arith.addf %119, %120 : vector<256x128xf32>
    %cst_22 = arith.constant 0.000000e+00 : f32
    %122 = vector.broadcast %cst_22 : f32 to vector<256x128xf32>
    %123 = arith.maximumf %121, %122 : vector<256x128xf32>
    %cst_23 = arith.constant dense<0.000000e+00> : vector<128xf32>
    %124 = vector.multi_reduction <add>, %123, %cst_23 [0] : vector<256x128xf32> to vector<128xf32>
    %125 = vector.shape_cast %124 : vector<128xf32> to vector<1x128xf32>
    %cst_24 = arith.constant 2.560000e+02 : f32
    %126 = vector.broadcast %cst_24 : f32 to vector<1x128xf32>
    %127 = arith.divf %125, %126 : vector<1x128xf32>
    %128 = tpu.concatenate %98, %127 in 0 : vector<1x128xf32>, vector<1x128xf32> -> vector<2x128xf32>
    %129 = arith.index_cast %arg0 : i32 to index
    %c0_25 = arith.constant 0 : index
    %c0_26 = arith.constant 0 : index
    %130 = vector.load %arg12[%129, %c0_25, %c0_26] : memref<1x2x128xf32, #tpu.memory_space<vmem>>, vector<1x2x128xf32>
    %131 = vector.shape_cast %130 : vector<1x2x128xf32> to vector<2x128xf32>
    %132 = vector.shape_cast %128 : vector<2x128xf32> to vector<1x2x128xf32>
    tpu.vector_store %arg12[%129, %c0_25, %c0_26], %132 {strides = array<i32>} : memref<1x2x128xf32, #tpu.memory_space<vmem>>, vector<1x2x128xf32>,
    %c0_i32_27 = arith.constant 0 : i32
    %133 = arith.cmpi eq, %arg0, %c0_i32_27 : i32
    %134 = arith.extui %133 : i1 to i32
    %c0_i32_28 = arith.constant 0 : i32
    %135 = arith.cmpi ne, %134, %c0_i32_28 : i32
    scf.if %135 {
      %c0_29 = arith.constant 0 : index
      %c0_30 = arith.constant 0 : index
      %c0_31 = arith.constant 0 : index
      %136 = vector.load %arg12[%c0_29, %c0_30, %c0_31] : memref<1x2x128xf32, #tpu.memory_space<vmem>>, vector<1x2x128xf32>
      %137 = vector.shape_cast %136 : vector<1x2x128xf32> to vector<2x128xf32>
      %c0_32 = arith.constant 0 : index
      %c0_33 = arith.constant 0 : index
      %138 = vector.load %arg10[%c0_32, %c0_33] : memref<2x128xf32, #tpu.memory_space<vmem>>, vector<2x128xf32>
      tpu.vector_store %arg10[%c0_32, %c0_33], %137 {strides = array<i32>} : memref<2x128xf32, #tpu.memory_space<vmem>>, vector<2x128xf32>,
      %139 = arith.truncf %137 : vector<2x128xf32> to vector<2x128xbf16>
      %c0_34 = arith.constant 0 : index
      %c0_35 = arith.constant 0 : index
      %140 = vector.load %arg4[%c0_34, %c0_35] : memref<128x128xbf16, #tpu.memory_space<vmem>>, vector<128x128xbf16>
      %cst_36 = arith.constant dense<0.000000e+00> : vector<2x128xf32>
      %141 = tpu.matmul %139, %140, %cst_36 {dimension_numbers = #tpu.dot_dimension_numbers<[1], [0], [0], [1], [0, 0, 1, 1], [], []>} : vector<2x128xbf16>, vector<128x128xbf16>, vector<2x128xf32> -> vector<2x128xf32>
      %c0_37 = arith.constant 0 : index
      %c0_38 = arith.constant 0 : index
      %142 = vector.load %arg5[%c0_37, %c0_38] : memref<1x128xf32, #tpu.memory_space<vmem>>, vector<1x128xf32>
      %143 = vector.broadcast %142 : vector<1x128xf32> to vector<2x128xf32>
      %144 = arith.addf %141, %143 : vector<2x128xf32>
      %cst_39 = arith.constant dense<0.000000e+00> : vector<128xf32>
      %145 = vector.multi_reduction <add>, %144, %cst_39 [0] : vector<2x128xf32> to vector<128xf32>
      %146 = vector.shape_cast %145 : vector<128xf32> to vector<1x128xf32>
      %cst_40 = arith.constant 2.000000e+00 : f32
      %147 = vector.broadcast %cst_40 : f32 to vector<1x128xf32>
      %148 = arith.divf %146, %147 : vector<1x128xf32>
      %149 = vector.broadcast %148 : vector<1x128xf32> to vector<2x128xf32>
      %150 = arith.subf %144, %149 : vector<2x128xf32>
      %151 = vector.broadcast %148 : vector<1x128xf32> to vector<2x128xf32>
      %152 = arith.subf %144, %151 : vector<2x128xf32>
      %153 = arith.mulf %150, %152 : vector<2x128xf32>
      %cst_41 = arith.constant dense<0.000000e+00> : vector<128xf32>
      %154 = vector.multi_reduction <add>, %153, %cst_41 [0] : vector<2x128xf32> to vector<128xf32>
      %155 = vector.shape_cast %154 : vector<128xf32> to vector<1x128xf32>
      %cst_42 = arith.constant 2.000000e+00 : f32
      %156 = vector.broadcast %cst_42 : f32 to vector<1x128xf32>
      %157 = arith.divf %155, %156 : vector<1x128xf32>
      %158 = vector.broadcast %148 : vector<1x128xf32> to vector<2x128xf32>
      %159 = arith.subf %144, %158 : vector<2x128xf32>
      %cst_43 = arith.constant 9.99999974E-6 : f32
      %160 = vector.broadcast %cst_43 : f32 to vector<1x128xf32>
      %161 = arith.addf %157, %160 : vector<1x128xf32>
      %162 = math.rsqrt %161 : vector<1x128xf32>
      %163 = vector.broadcast %162 : vector<1x128xf32> to vector<2x128xf32>
      %164 = arith.mulf %159, %163 : vector<2x128xf32>
      %c0_44 = arith.constant 0 : index
      %c0_45 = arith.constant 0 : index
      %165 = vector.load %arg6[%c0_44, %c0_45] : memref<1x128xf32, #tpu.memory_space<vmem>>, vector<1x128xf32>
      %166 = vector.broadcast %165 : vector<1x128xf32> to vector<2x128xf32>
      %167 = arith.mulf %164, %166 : vector<2x128xf32>
      %c0_46 = arith.constant 0 : index
      %c0_47 = arith.constant 0 : index
      %168 = vector.load %arg7[%c0_46, %c0_47] : memref<1x128xf32, #tpu.memory_space<vmem>>, vector<1x128xf32>
      %169 = vector.broadcast %168 : vector<1x128xf32> to vector<2x128xf32>
      %170 = arith.addf %167, %169 : vector<2x128xf32>
      %cst_48 = arith.constant 0.000000e+00 : f32
      %171 = vector.broadcast %cst_48 : f32 to vector<2x128xf32>
      %172 = arith.maximumf %170, %171 : vector<2x128xf32>
      %173 = arith.truncf %172 : vector<2x128xf32> to vector<2x128xbf16>
      %c0_49 = arith.constant 0 : index
      %c0_50 = arith.constant 0 : index
      %174 = vector.load %arg8[%c0_49, %c0_50] : memref<128x128xbf16, #tpu.memory_space<vmem>>, vector<128x128xbf16>
      %cst_51 = arith.constant dense<0.000000e+00> : vector<2x128xf32>
      %175 = tpu.matmul %173, %174, %cst_51 {dimension_numbers = #tpu.dot_dimension_numbers<[1], [0], [0], [1], [0, 0, 1, 1], [], []>} : vector<2x128xbf16>, vector<128x128xbf16>, vector<2x128xf32> -> vector<2x128xf32>
      %c0_52 = arith.constant 0 : index
      %c0_53 = arith.constant 0 : index
      %176 = vector.load %arg9[%c0_52, %c0_53] : memref<1x128xf32, #tpu.memory_space<vmem>>, vector<1x128xf32>
      %177 = vector.broadcast %176 : vector<1x128xf32> to vector<2x128xf32>
      %178 = arith.addf %175, %177 : vector<2x128xf32>
      %c0_54 = arith.constant 0 : index
      %c0_55 = arith.constant 0 : index
      %179 = vector.load %arg11[%c0_54, %c0_55] : memref<2x128xf32, #tpu.memory_space<vmem>>, vector<2x128xf32>
      tpu.vector_store %arg11[%c0_54, %c0_55], %178 {strides = array<i32>} : memref<2x128xf32, #tpu.memory_space<vmem>>, vector<2x128xf32>,
    } else {
    }
    return
  }
  func.func @transform_0(%arg0: i32) -> (i32, i32, i32) {
    %c0_i32 = arith.constant 0 : i32
    %c0_i32_0 = arith.constant 0 : i32
    %c0_i32_1 = arith.constant 0 : i32
    return %arg0, %c0_i32, %c0_i32_0 : i32, i32, i32
  }
  func.func @transform_1(%arg0: i32) -> (i32, i32) {
    %c0_i32 = arith.constant 0 : i32
    %c0_i32_0 = arith.constant 0 : i32
    %c0_i32_1 = arith.constant 0 : i32
    return %c0_i32, %c0_i32_0 : i32, i32
  }
  func.func @transform_2(%arg0: i32) -> (i32, i32) {
    %c0_i32 = arith.constant 0 : i32
    %c0_i32_0 = arith.constant 0 : i32
    %c0_i32_1 = arith.constant 0 : i32
    return %c0_i32, %c0_i32_0 : i32, i32
  }
  func.func @transform_3(%arg0: i32) -> (i32, i32) {
    %c0_i32 = arith.constant 0 : i32
    %c0_i32_0 = arith.constant 0 : i32
    %c0_i32_1 = arith.constant 0 : i32
    return %c0_i32, %c0_i32_0 : i32, i32
  }
  func.func @transform_4(%arg0: i32) -> (i32, i32) {
    %c0_i32 = arith.constant 0 : i32
    %c0_i32_0 = arith.constant 0 : i32
    %c0_i32_1 = arith.constant 0 : i32
    return %c0_i32, %c0_i32_0 : i32, i32
  }
  func.func @transform_5(%arg0: i32) -> (i32, i32) {
    %c0_i32 = arith.constant 0 : i32
    %c0_i32_0 = arith.constant 0 : i32
    %c0_i32_1 = arith.constant 0 : i32
    return %c0_i32, %c0_i32_0 : i32, i32
  }
  func.func @transform_6(%arg0: i32) -> (i32, i32) {
    %c0_i32 = arith.constant 0 : i32
    %c0_i32_0 = arith.constant 0 : i32
    %c0_i32_1 = arith.constant 0 : i32
    return %c0_i32, %c0_i32_0 : i32, i32
  }
  func.func @transform_7(%arg0: i32) -> (i32, i32) {
    %c0_i32 = arith.constant 0 : i32
    %c0_i32_0 = arith.constant 0 : i32
    %c0_i32_1 = arith.constant 0 : i32
    return %c0_i32, %c0_i32_0 : i32, i32
  }
  func.func @transform_8(%arg0: i32) -> (i32, i32) {
    %c0_i32 = arith.constant 0 : i32
    %c0_i32_0 = arith.constant 0 : i32
    %c0_i32_1 = arith.constant 0 : i32
    return %c0_i32, %c0_i32_0 : i32, i32
  }
  func.func @transform_9(%arg0: i32) -> (i32, i32) {
    %c0_i32 = arith.constant 0 : i32
    %c0_i32_0 = arith.constant 0 : i32
    %c0_i32_1 = arith.constant 0 : i32
    return %c0_i32, %c0_i32_0 : i32, i32
  }
  func.func @transform_10(%arg0: i32) -> (i32, i32) {
    %c0_i32 = arith.constant 0 : i32
    %c0_i32_0 = arith.constant 0 : i32
    %c0_i32_1 = arith.constant 0 : i32
    return %c0_i32, %c0_i32_0 : i32, i32
  }
}

</mosaic_0001>

<bundles_post_ra>
// kernel: base_method_forward.1
= control target key start
LH: loop header
LB: loop body
LE: loop exit
PB: predicated region body
PF: predicated region fallthrough
CT: control target
= control target key end

     0   :  { %16 = vsyncpa [#allocation4], 0  ;;  %s2147_s0 = inlined_call_operand.vmem [shape: f32[2,4,256], index: 0, kind: input, shape index: {}]   ;;  %s2148_s1 = inlined_call_operand.vmem [shape: bf16[36,128], index: 1, kind: input, shape index: {}]   ;;  %s2149_s2 = inlined_call_operand.vmem [shape: f32[1,128], index: 2, kind: input, shape index: {}]   ;;  %s2150_s3 = inlined_call_operand.vmem [shape: bf16[128,128], index: 3, kind: input, shape index: {}]   ;;  %s2151_s4 = inlined_call_operand.vmem [shape: f32[1,128], index: 4, kind: input, shape index: {}]   ;;  %s2152_s5 = inlined_call_operand.vmem [shape: f32[1,128], index: 5, kind: input, shape index: {}]   ;;  %s2153_s6 = inlined_call_operand.hbm [shape: f32[1,128], index: 6, kind: input, shape index: {}]   ;;  %s2154_s7 = inlined_call_operand.vmem [shape: bf16[128,128], index: 7, kind: input, shape index: {}]   ;;  %s2155_s8 = inlined_call_operand.vmem [shape: f32[1,128], index: 8, kind: input, shape index: {}]   ;;  %s2156_s9 = inlined_call_operand.hbm [shape: f32[2,128], index: 9, kind: output, shape index: {0}]   ;;  %s2157_s10 = inlined_call_operand.hbm [shape: f32[2,128], index: 10, kind: output, shape index: {1}]  }
   0x1   :  { %17 = vsyncpa [#allocation5], 0 }
   0x2   :  { %18 = vsyncpa [#allocation8], 0  ;;  %s1647_s13 = smov [#allocation3]   ;;  %s1575_s17 = scalar_lea.hbm %s2153_s6, 16 }
   0x3   :  { %s37_s14 = sshll.u32 %s1647_s13, 4  ;;  %p1576_p0 = scmp.ne.s32.totalorder %s2153_s6, %s1575_s17  ;;  %s38_s14 = int_to_ptr.vmem [resolvable:$true] %s37_s14 }
   0x4   :  { %p1579_p1 = scmp.lt.u32.totalorder %s1575_s17, %s2153_s6 }
   0x6   :  { %p1581_p2 = pnand %p1579_p1, %p1576_p0 }
   0x8   :  { %1584 = shalt.err (!%p1581_p2)
}
   0x9   :  { %s1585_s22 = scalar_lea.vmem %s38_s14, 16  ;;  %s1589_s23 = scalar_lea.vmem %s38_s14, 32 }
   0xa   :  { %p1586_p3 = scmp.ne.s32.totalorder %s38_s14, %s1585_s22  ;;  %p1590_p4 = scmp.lt.s32.totalorder %s38_s14, %s38_s14 }
   0xb   :  { %p1591_p5 = scmp.lt.s32.totalorder %s1589_s23, %s1585_s22 }
   0xd   :  { %p1592_p6 = por %p1591_p5, %p1590_p4 }
   0xf   :  { %p1593_p7 = pnand %p1592_p6, %p1586_p3 }
  0x11   :  { %1596 = shalt.err (!%p1593_p7)
}
  0x12   :  { %40 = dma.hbm_to_vmem [thread:$0]  %s2153_s6, 16, %s38_s14, [#allocation4]  }
  0x13   :  { %1641 = dma.done.wait [#allocation4], 16  }
  0x14   :  { %1642 = vsyncadd [#allocation4], 4294967280  ;;  %v1730_v0 = vld [vmem:[%s2147_s0] sm:$0xff]  ;;  %v1735_v1 = vld [vmem:[%s2147_s0 + $0x8] sm:$0xff]  ;;  %s1648_s30 = smov 17   ;;  %s1649_s11 = smov 1   ;;  %v51_v10 = vlaneseq }
  0x15   :  { %94 = vrot.lane.b32.xlu1 %v1730_v0, %s1648_s30  ;;  %151 = vrot.lane.b32.xlu0 %v1730_v0, %s1649_s11  ;;  %v1532_v2 = vpack.i.bf16 %v1735_v1, %v1730_v0  ;;  %s1650_s6 = smov 15   ;;  %s1651_s0 = smov 16   ;;  %v1754_v3 = vcombine.high %v1730_v0, %v1730_v0  ;;  %v1760_v4 = vcombine.high %v1735_v1, %v1735_v1  ;;  %v1554_v8 = vld [vmem:[%s2148_s1] sm:$0xff]   ;;  %v1555_v9 = vld [vmem:[%s2148_s1 + $0x8] sm:$0xff]   ;;  %vm159_vm1 = vcmask 7168  }
  0x16   :  { %s1652_s12 = smov 127   ;;  %s1653_s13 = smov 113   ;;  %1400 = vmatprep.subr.bf16.mxu0 %v1554_v8  ;;  %1438 = vmatprep.subr.bf16.mxu1 %v1554_v8  ;;  %v1795_v11 = vand.u32 127, %v51_v10  ;;  %v1656_v17 = vmov 0.0   ;;  %vm102_vm3 = vcmask 138240   ;;  %vm138_vm4 = vcmask 121856  }
  0x17   :  { %v1537_v5 = vpack.i.bf16 %v1754_v3, %v1730_v0  ;;  %s1654_s14 = smov 112   ;;  %v1542_v6 = vpack.i.bf16 %v1760_v4, %v1735_v1  ;;  %s1655_s15 = smov 111   ;;  %v1547_v7 = vpack.i.bf16 %v1760_v4, %v1754_v3  ;;  %1401 = vmatpush3.bf16.msra.mxu0 %v1554_v8  ;;  %1439 = vmatpush3.bf16.msra.mxu1 %v1554_v8  ;;  %v1556_v22 = vld [vmem:[%s2148_s1 + $0x10] ss:$0 sps:$4 sm:$0x33]   ;;  %vm123_vm5 = vcmask 130048  }
  0x18   :  { %1402 = vmatprep.subr.bf16.mxu0 %v1555_v9  ;;  %1440 = vmatprep.subr.bf16.mxu1 %v1555_v9  ;;  %v58_v12 = vand.u32 15, %v1795_v11  ;;  %vm396_vm6 = vcmask 1041408   ;;  %vm279_vm7 = vcmask 1043456   ;;  %vm180_vm8 = vcmask 1039360  }
  0x19   :  { %98 = vrot.lane.b32.xlu1 %v1735_v1, %s1648_s30  ;;  %155 = vrot.lane.b32.xlu0 %v1735_v1, %s1649_s11  ;;  %v398_v30 = vsel %vm396_vm6, %v1556_v22, 0  ;;  %vm201_vm9 = vcmask 924672   ;;  %vm222_vm10 = vcmask 916480   ;;  %vm237_vm11 = vcmask 908288  }
  0x1a   :  { %vm78_vm0 = vcmp.ge.s32.totalorder %v58_v12, 1  ;;  %vm84_vm2 = vcmp.le.s32.totalorder %v58_v12, 14  ;;  %vm347_vm14 = vcmask 293888   ;;  %vm1657_vm15 = vmmov 0  }
  0x1b   :  { %1403 = vmatpush3.bf16.msra.mxu0 %v1555_v9  ;;  %1441 = vmatpush3.bf16.msra.mxu1 %v1555_v9  ;;  %v1807_v18 = vsel %vm78_vm0, 1.0, %v1656_v17  ;;  %v1814_v21 = vsel %vm84_vm2, 1.0, %v1656_v17  ;;  %vm980_vm0 = vcmask 1040384  }
  0x1c   :  { %1516 = vmatprep.subr.msk.bf16.mxu0 %vm396_vm6, %v1556_v22  ;;  %1517 = vmatprep.subr.msk.bf16.mxu1 %vm396_vm6, %v1556_v22 }
  0x1d   :  { %130 = vrot.lane.b32.xlu1 %v1730_v0, %s1650_s6  ;;  %1533 = vrot.lane.b32.xlu0 %v1532_v2, %s1651_s0 }
  0x1f   :  { %1405 = vmatpush3.bf16.msra.mxu0 %v398_v30  ;;  %1443 = vmatpush3.bf16.msra.mxu1 %v398_v30 }
  0x20   :  { %1476 = vmatprep.subr.bf16.mxu0 %v1656_v17  ;;  %1496 = vmatprep.subr.bf16.mxu1 %v1656_v17 }
  0x21   :  { %172 = vrot.lane.b32.xlu1 %v1730_v0, %s1652_s12  ;;  %134 = vrot.lane.b32.xlu0 %v1735_v1, %s1650_s6 }
  0x25   :  { %176 = vrot.lane.b32.xlu1 %v1735_v1, %s1652_s12  ;;  %174 = vrot.lane.b32.xlu0 %v1754_v3, %s1652_s12 }
  0x29   :  { %193 = vrot.lane.b32.xlu1 %v1730_v0, %s1653_s13  ;;  %178 = vrot.lane.b32.xlu0 %v1760_v4, %s1652_s12 }
  0x2d   :  { %197 = vrot.lane.b32.xlu1 %v1735_v1, %s1653_s13  ;;  %195 = vrot.lane.b32.xlu0 %v1754_v3, %s1653_s13 }
  0x31   :  { %1538 = vrot.lane.b32.xlu1 %v1537_v5, %s1654_s14  ;;  %199 = vrot.lane.b32.xlu0 %v1760_v4, %s1653_s13 }
  0x35   :  { %229 = vrot.lane.b32.xlu1 %v1730_v0, %s1655_s15  ;;  %1543 = vrot.lane.b32.xlu0 %v1542_v6, %s1654_s14 }
  0x39   :  { %233 = vrot.lane.b32.xlu1 %v1735_v1, %s1655_s15  ;;  %231 = vrot.lane.b32.xlu0 %v1754_v3, %s1655_s15 }
  0x3d   :  { %153 = vrot.lane.b32.xlu1 %v1754_v3, %s1649_s11  ;;  %235 = vrot.lane.b32.xlu0 %v1760_v4, %s1655_s15 }
  0x41   :  { %96 = vrot.lane.b32.xlu1 %v1754_v3, %s1648_s30  ;;  %157 = vrot.lane.b32.xlu0 %v1760_v4, %s1649_s11 }
  0x45   :  { %1548 = vrot.lane.b32.xlu1 %v1547_v7, %s1651_s0  ;;  %100 = vrot.lane.b32.xlu0 %v1760_v4, %s1648_s30 }
  0x49   :  { %136 = vrot.lane.b32.xlu1 %v1760_v4, %s1650_s6  ;;  %132 = vrot.lane.b32.xlu0 %v1754_v3, %s1650_s6  ;;  %s1658_s6 = smov [#allocation6]  }
  0x4a   :  { %s1261_s0 = sshll.u32 %s1658_s6, 4  ;;  %s1262_s0 = int_to_ptr.vmem [resolvable:$true] %s1261_s0 }
  0x4b   :  { %s1597_s12 = scalar_lea.vmem %s1262_s0, 32  ;;  %p1602_p9 = scmp.lt.s32.totalorder %s1262_s0, %s1262_s0 }
  0x4c   :  { %p1598_p8 = scmp.ne.s32.totalorder %s1262_s0, %s1597_s12  ;;  %p1603_p10 = scmp.lt.s32.totalorder %s1597_s12, %s1597_s12 }
  0x4e   :  { %p1604_p11 = por %p1603_p10, %p1602_p9 }
  0x50   :  { %p1605_p12 = pnand %p1604_p11, %p1598_p8 }
  0x87   :  { %v1798_v13 = vpop.permute.xlu1 %94  ;;  %v1800_v14 = vpop.permute.xlu0 %151 }
  0x88   :  { %v166_v19 = vsel %vm159_vm1, 0.0, %v1800_v14  ;;  %v109_v23 = vsel %vm102_vm3, 0.0, %v1798_v13 }
  0x89   :  { %v168_v24 = vmul.f32 %v1807_v18, %v166_v19  ;;  %v111_v36 = vmul.f32 %v1807_v18, %v109_v23 }
  0x8b   :  { %v1802_v15 = vpop.permute.xlu1 %98  ;;  %v1804_v16 = vpop.permute.xlu0 %155  ;;  %v263_v37 = vrot.slane %v168_v24, 4 }
  0x8c   :  { %v167_v20 = vsel %vm159_vm1, 0.0, %v1804_v16  ;;  %v110_v31 = vsel %vm102_vm3, 0.0, %v1802_v15 }
  0x8d   :  { %v170_v32 = vmul.f32 %v1807_v18, %v167_v20  ;;  %v113_v42 = vmul.f32 %v1807_v18, %v110_v31 }
  0x8f   :  { %v1822_v25 = vpop.permute.xlu1 %130  ;;  %v1824_v26 = vpop.permute.xlu0 %1533  ;;  %v639_v44 = vrot.slane %v170_v32, 4 }
  0x90   :  { %v145_v27 = vsel %vm138_vm4, 0.0, %v1822_v25  ;;  %v1536_v28 = vunpack.i.h.bf16 %v1824_v26  ;;  %v1535_v29 = vunpack.i.l.bf16 %v1824_v26 }
  0x91   :  { %v147_v33 = vmul.f32 %v1814_v21, %v145_v27 }
  0x92   :  { %v129_v34 = vsel %vm123_vm5, 0.0, %v1536_v28  ;;  %v128_v35 = vsel %vm123_vm5, 0.0, %v1535_v29 }
  0x93   :  { %v633_v38 = vrot.slane %v129_v34, 4  ;;  %v257_v39 = vrot.slane %v128_v35, 4  ;;  %v173_v40 = vpop.permute.xlu1 %172  ;;  %v1846_v41 = vpop.permute.xlu0 %134  ;;  %v282_v47 = vsel %vm279_vm7, %v147_v33, %v263_v37 }
  0x94   :  { %v146_v43 = vsel %vm138_vm4, 0.0, %v1846_v41 }
  0x95   :  { %v149_v45 = vmul.f32 %v1814_v21, %v146_v43  ;;  %v280_v46 = vsel %vm279_vm7, %v111_v36, %v257_v39  ;;  %v655_v51 = vsel %vm279_vm7, %v113_v42, %v633_v38 }
  0x96   :  { %v288_v48 = vpack.c.bf16 %v282_v47, %v280_v46 }
  0x97   :  { %v177_v49 = vpop.permute.xlu1 %176  ;;  %v1854_v50 = vpop.permute.xlu0 %174  ;;  %v657_v52 = vsel %vm279_vm7, %v149_v45, %v639_v44 }
  0x98   :  { %300 = vxpose.xlu0.c.b16.start [1/3] (short) %v288_v48, 128  ;;  %v663_v53 = vpack.c.bf16 %v657_v52, %v655_v51  ;;  %v181_v56 = vsel %vm180_vm8, %v173_v40, %v1854_v50 }
  0x99   :  { %v189_v59 = vmul.f32 %v1814_v21, %v181_v56 }
  0x9a   :  { %669 = vxpose.xlu1.c.b16.start [1/3] (short) %v663_v53, 128 }
  0x9b   :  { %v194_v54 = vpop.permute.xlu1 %193  ;;  %v1858_v55 = vpop.permute.xlu0 %178  ;;  %v270_v6 = vrot.slane %v189_v59, 4 }
  0x9c   :  { %v182_v60 = vsel %vm180_vm8, %v177_v49, %v1858_v55 }
  0x9d   :  { %v191_v7 = vmul.f32 %v1814_v21, %v182_v60  ;;  %v284_v27 = vsel %vm279_vm7, %v1730_v0, %v270_v6 }
  0x9f   :  { %v198_v57 = vpop.permute.xlu1 %197  ;;  %v1862_v58 = vpop.permute.xlu0 %195  ;;  %v646_v24 = vrot.slane %v191_v7, 4 }
  0xa0   :  { %v202_v63 = vsel %vm201_vm9, %v194_v54, %v1862_v58 }
  0xa1   :  { %v210_v9 = vmul.f32 %v1807_v18, %v202_v63  ;;  %v659_v0 = vsel %vm279_vm7, %v1735_v1, %v646_v24 }
  0xa3   :  { %v1539_v61 = vpop.permute.xlu1 %1538  ;;  %v1867_v62 = vpop.permute.xlu0 %199 }
  0xa4   :  { %v1541_v2 = vunpack.i.h.bf16 %v1539_v61  ;;  %v1540_v5 = vunpack.i.l.bf16 %v1539_v61  ;;  %v203_v20 = vsel %vm201_vm9, %v198_v57, %v1867_v62 }
  0xa5   :  { %v212_v33 = vmul.f32 %v1807_v18, %v203_v20  ;;  %v53_v18 = vadd.s32 128, %v1795_v11 }
  0xa6   :  { %v223_v8 = vsel %vm222_vm10, %v1540_v5, %v1541_v2  ;;  %v227_v6 = vsel %vm222_vm10, %v1541_v2, 0.0 }
  0xa7   :  { %v275_v10 = vrot.slane %v223_v8, 4  ;;  %v230_v12 = vpop.permute.xlu1 %229  ;;  %v1874_v19 = vpop.permute.xlu0 %1543  ;;  %v65_v1 = vand.u32 15, %v53_v18 }
  0xa8   :  { %v1546_v22 = vunpack.i.h.bf16 %v1874_v19  ;;  %v1545_v23 = vunpack.i.l.bf16 %v1874_v19 }
  0xa9   :  { %v286_v30 = vsel %vm279_vm7, %v210_v9, %v275_v10  ;;  %vm79_vm12 = vcmp.ge.s32.totalorder %v65_v1, 1  ;;  %vm85_vm13 = vcmp.le.s32.totalorder %v65_v1, 14 }
  0xaa   :  { %v224_v31 = vsel %vm222_vm10, %v1545_v23, %v1546_v22  ;;  %v290_v32 = vpack.c.bf16 %v286_v30, %v284_v27  ;;  %v1285_v54 = vsel %vm79_vm12, 1.0, %v1656_v17  ;;  %v1287_v56 = vsel %vm85_vm13, 1.0, %v1656_v17 }
  0xab   :  { %v651_v34 = vrot.slane %v224_v31, 4  ;;  %v234_v35 = vpop.permute.xlu1 %233  ;;  %v1887_v36 = vpop.permute.xlu0 %231 }
  0xac   :  { %v238_v37 = vsel %vm237_vm11, %v230_v12, %v1887_v36  ;;  %301 = vxpose.xlu0.c.b16.cont [2/3] (short) %v290_v32, 128  ;;  %v244_v19 = vsel %vm237_vm11, %v1887_v36, 0.0 }
  0xad   :  { %v246_v38 = vmul.f32 %v1814_v21, %v238_v37  ;;  %v661_v39 = vsel %vm279_vm7, %v212_v33, %v651_v34 }
  0xae   :  { %v665_v40 = vpack.c.bf16 %v661_v39, %v659_v0 }
  0xaf   :  { %v292_v42 = vpack.c.bf16 %v246_v38, %v246_v38  ;;  %v154_v43 = vpop.permute.xlu1 %153  ;;  %v1895_v44 = vpop.permute.xlu0 %235 }
  0xb0   :  { %v239_v45 = vsel %vm237_vm11, %v234_v35, %v1895_v44  ;;  %670 = vxpose.xlu1.c.b16.cont [2/3] (short) %v665_v40, 128  ;;  %v160_v53 = vsel %vm159_vm1, %v1800_v14, %v154_v43  ;;  %v247_v40 = vmul.f32 %v1287_v56, %v244_v19  ;;  %v245_v43 = vsel %vm237_vm11, %v1895_v44, 0.0 }
  0xb1   :  { %v248_v46 = vmul.f32 %v1814_v21, %v239_v45  ;;  %302 = vxpose.xlu0.c.b16.end [3/3] (short) %v292_v42, 128  ;;  %v187_v21 = vsel %vm180_vm8, %v1854_v50, 0.0  ;;  %v169_v57 = vmul.f32 %v1285_v54, %v160_v53 }
  0xb2   :  { %v190_v8 = vmul.f32 %v1287_v56, %v187_v21  ;;  %v293_v45 = vpack.c.bf16 %v247_v40, %v247_v40 }
  0xb3   :  { %v667_v47 = vpack.c.bf16 %v248_v46, %v248_v46  ;;  %v97_v48 = vpop.permute.xlu1 %96  ;;  %v158_v49 = vpop.permute.xlu0 %157  ;;  %v264_v10 = vrot.slane %v169_v57, 4  ;;  %v249_v46 = vmul.f32 %v1287_v56, %v245_v43 }
  0xb4   :  { %v161_v61 = vsel %vm159_vm1, %v1804_v16, %v158_v49  ;;  %v103_v50 = vsel %vm102_vm3, %v1798_v13, %v97_v48  ;;  %v208_v16 = vsel %vm201_vm9, %v1862_v58, 0.0  ;;  %v271_v27 = vrot.slane %v190_v8, 4 }
  0xb5   :  { %671 = vxpose.xlu1.c.b16.end [3/3] (short) %v667_v47, 128  ;;  %v171_v12 = vmul.f32 %v1285_v54, %v161_v61  ;;  %v112_v23 = vmul.f32 %v1285_v54, %v103_v50  ;;  %v228_v58 = vsel %vm222_vm10, %v1546_v22, 0.0 }
  0xb6   :  { %v652_v35 = vrot.slane %v228_v58, 4  ;;  %v285_v0 = vsel %vm279_vm7, %v1754_v3, %v271_v27  ;;  %v668_v3 = vpack.c.bf16 %v249_v46, %v249_v46  ;;  %v1559_v27 = vld [vmem:[%s2150_s3 + $0x10] sm:$0xff]   ;;  %v1561_v58 = vld [vmem:[%s2150_s3 + $0x20] sm:$0xff]  }
  0xb7   :  { %v1549_v51 = vpop.permute.xlu1 %1548  ;;  %v101_v52 = vpop.permute.xlu0 %100 }
  0xb8   :  { %v1550_v11 = vunpack.i.l.bf16 %v1549_v51  ;;  %v1551_v63 = vunpack.i.h.bf16 %v1549_v51  ;;  %v104_v30 = vsel %vm102_vm3, %v1802_v15, %v101_v52 }
  0xb9   :  { %v114_v37 = vmul.f32 %v1285_v54, %v104_v30  ;;  %v1562_v30 = vld [vmem:[%s2150_s3 + $0x28] sm:$0xff]  }
  0xba   :  { %v124_v5 = vsel %vm123_vm5, %v1535_v29, %v1550_v11  ;;  %v188_v29 = vsel %vm180_vm8, %v1858_v55, 0.0  ;;  %v125_v2 = vsel %vm123_vm5, %v1536_v28, %v1551_v63  ;;  %v640_v55 = vrot.slane %v171_v12, 4 }
  0xbb   :  { %v137_v59 = vpop.permute.xlu1 %136  ;;  %v133_v60 = vpop.permute.xlu0 %132  ;;  %v258_v20 = vrot.slane %v124_v5, 4  ;;  %v192_v31 = vmul.f32 %v1287_v56, %v188_v29  ;;  %v634_v32 = vrot.slane %v125_v2, 4  ;;  %v209_v28 = vsel %vm201_vm9, %v1867_v62, 0.0 }
  0xbc   :  { %v139_v14 = vsel %vm138_vm4, %v1822_v25, %v133_v60  ;;  %v140_v9 = vsel %vm138_vm4, %v1846_v41, %v137_v59  ;;  %v276_v25 = vrot.slane %v227_v6, 4  ;;  %v211_v41 = vmul.f32 %v1285_v54, %v208_v16 }
  0xbd   :  { %v148_v7 = vmul.f32 %v1287_v56, %v139_v14  ;;  %v150_v24 = vmul.f32 %v1287_v56, %v140_v9  ;;  %v281_v26 = vsel %vm279_vm7, %v112_v23, %v258_v20  ;;  %v647_v15 = vrot.slane %v192_v31, 4  ;;  %v1563_v31 = vld [vmem:[%s2150_s3 + $0x30] sm:$0xff]  }
  0xbe   :  { %v287_v34 = vsel %vm279_vm7, %v211_v41, %v276_v25  ;;  %v213_v38 = vmul.f32 %v1285_v54, %v209_v28  ;;  %v656_v39 = vsel %vm279_vm7, %v114_v37, %v634_v32  ;;  %v1560_v41 = vld [vmem:[%s2150_s3 + $0x18] sm:$0xff]   ;;  %v1565_v32 = vld [vmem:[%s2154_s7] sm:$0xff]  }
  0xbf   :  { %v283_v13 = vsel %vm279_vm7, %v148_v7, %v264_v10  ;;  %v658_v22 = vsel %vm279_vm7, %v150_v24, %v640_v55  ;;  %v291_v62 = vpack.c.bf16 %v287_v34, %v285_v0  ;;  %v660_v36 = vsel %vm279_vm7, %v1760_v4, %v647_v15  ;;  %v1557_v24 = vld [vmem:[%s2150_s3] sm:$0xff]   ;;  %v1564_v55 = vld [vmem:[%s2150_s3 + $0x38] sm:$0xff]  }
  0xc0   :  { %v289_v33 = vpack.c.bf16 %v283_v13, %v281_v26  ;;  %v664_v42 = vpack.c.bf16 %v658_v22, %v656_v39  ;;  %v662_v18 = vsel %vm279_vm7, %v213_v38, %v652_v35  ;;  %v1558_v13 = vld [vmem:[%s2150_s3 + $0x8] sm:$0xff]   ;;  %v2019_v26 = vld [vmem:[%s2149_s2] ss:$0 sm:$0xff] }
  0xc1   :  { %v666_v47 = vpack.c.bf16 %v662_v18, %v660_v36 }
  0xc6   :  { %316 = vxpose.xlu0.c.b16.start [1/3] (short) %v289_v33, 128 }
  0xca   :  { %317 = vxpose.xlu0.c.b16.cont [2/3] (short) %v291_v62, 128  ;;  %685 = vxpose.xlu1.c.b16.start [1/3] (short) %v664_v42, 128 }
  0xce   :  { %318 = vxpose.xlu0.c.b16.end [3/3] (short) %v293_v45, 128  ;;  %686 = vxpose.xlu1.c.b16.cont [2/3] (short) %v666_v47, 128 }
  0xd2   :  { %687 = vxpose.xlu1.c.b16.end [3/3] (short) %v668_v3, 128 }
 0x10f   :  { %v308_v48 = vpop.trf.xlu0 }
 0x110   :  { %1406 = vmatprep.mubr.msk.bf16.mxu0 %vm347_vm14, %v308_v48 }
 0x113   :  { %v309_v49 = vpop.trf.xlu0  ;;  %v677_v44 = vpop.trf.xlu1 }
 0x114   :  { %1407 = vmatmul.mubr.msk.bf16.vlgmr.msra.gmra.mrb[0].mxu0 %vm347_vm14, %v309_v49  ;;  %1444 = vmatprep.mubr.msk.bf16.mxu1 %vm347_vm14, %v677_v44 }
 0x115   :  { %1477 = vmatpush3.bf16.msra.mxu0 %v1557_v24 }
 0x116   :  { %1478 = vmatprep.subr.bf16.mxu0 %v1656_v17 }
 0x117   :  { %v310_v1 = vpop.trf.xlu0  ;;  %v678_v51 = vpop.trf.xlu1 }
 0x118   :  { %1445 = vmatmul.mubr.msk.bf16.vlgmr.msra.gmra.mrb[0].mxu1 %vm347_vm14, %v678_v51  ;;  %1410 = vmatprep.mubr.msk.bf16.mxu0 %vm347_vm14, %v310_v1 }
 0x119   :  { %1479 = vmatpush3.bf16.msra.mxu0 %v1558_v13  ;;  %1497 = vmatpush3.bf16.msra.mxu1 %v1565_v32 }
 0x11a   :  { %1480 = vmatprep.subr.bf16.mxu0 %v1656_v17  ;;  %1498 = vmatprep.subr.bf16.mxu1 %v1656_v17 }
 0x11b   :  { %v311_v4 = vpop.trf.xlu0  ;;  %v679_v52 = vpop.trf.xlu1 }
 0x11c   :  { %1411 = vmatmul.mubr.msk.bf16.gmra.mrb[4].mxu0 %vm347_vm14, %v311_v4  ;;  %1448 = vmatprep.mubr.msk.bf16.mxu1 %vm347_vm14, %v679_v52 }
 0x11d   :  { %1481 = vmatpush3.bf16.msra.mxu0 %v1559_v27 }
 0x11e   :  { %1482 = vmatprep.subr.bf16.mxu0 %v1656_v17 }
 0x11f   :  { %v312_v53 = vpop.trf.xlu0  ;;  %v680_v11 = vpop.trf.xlu1 }
 0x120   :  { %1449 = vmatmul.mubr.msk.bf16.gmra.mrb[4].mxu1 %vm347_vm14, %v680_v11  ;;  %1414 = vmatprep.mubr.msk.bf16.mxu0 %vm347_vm14, %v312_v53 }
 0x121   :  { %1483 = vmatpush3.bf16.msra.mxu0 %v1560_v41 }
 0x122   :  { %1484 = vmatprep.subr.bf16.mxu0 %v1656_v17 }
 0x123   :  { %v313_v54 = vpop.trf.xlu0  ;;  %v681_v56 = vpop.trf.xlu1 }
 0x124   :  { %1415 = vmatmul.mubr.msk.bf16.gmra.mrb[8].mxu0 %vm347_vm14, %v313_v54  ;;  %1452 = vmatprep.mubr.msk.bf16.mxu1 %vm347_vm14, %v681_v56 }
 0x125   :  { %1485 = vmatpush3.bf16.msra.mxu0 %v1561_v58 }
 0x126   :  { %1486 = vmatprep.subr.bf16.mxu0 %v1656_v17 }
 0x127   :  { %v314_v21 = vpop.trf.xlu0  ;;  %v682_v57 = vpop.trf.xlu1 }
 0x128   :  { %1453 = vmatmul.mubr.msk.bf16.gmra.mrb[8].mxu1 %vm347_vm14, %v682_v57  ;;  %1418 = vmatprep.mubr.msk.bf16.mxu0 %vm347_vm14, %v314_v21 }
 0x129   :  { %1487 = vmatpush3.bf16.msra.mxu0 %v1562_v30 }
 0x12a   :  { %1488 = vmatprep.subr.bf16.mxu0 %v1656_v17 }
 0x12b   :  { %v315_v59 = vpop.trf.xlu0  ;;  %v683_v60 = vpop.trf.xlu1 }
 0x12c   :  { %1419 = vmatmul.mubr.msk.bf16.gmra.mrb[12].mxu0 %vm347_vm14, %v315_v59  ;;  %1456 = vmatprep.mubr.msk.bf16.mxu1 %vm347_vm14, %v683_v60 }
 0x12d   :  { %1489 = vmatpush3.bf16.msra.mxu0 %v1563_v31 }
 0x12e   :  { %1490 = vmatprep.subr.bf16.mxu0 %v1656_v17 }
 0x12f   :  { %v324_v61 = vpop.trf.xlu0  ;;  %v684_v63 = vpop.trf.xlu1 }
 0x130   :  { %1457 = vmatmul.mubr.msk.bf16.gmra.mrb[12].mxu1 %vm347_vm14, %v684_v63  ;;  %1422 = vmatprep.mubr.msk.bf16.mxu0 %vm347_vm14, %v324_v61 }
 0x131   :  { %1491 = vmatpush3.bf16.msra.mxu0 %v1564_v55 }
 0x133   :  { %v325_v5 = vpop.trf.xlu0  ;;  %v693_v14 = vpop.trf.xlu1 }
 0x134   :  { %1423 = vmatmul.mubr.msk.bf16.gmra.mrb[16].mxu0 %vm347_vm14, %v325_v5  ;;  %1460 = vmatprep.mubr.msk.bf16.mxu1 %vm347_vm14, %v693_v14 }
 0x137   :  { %v326_v6 = vpop.trf.xlu0  ;;  %v694_v7 = vpop.trf.xlu1 }
 0x138   :  { %1461 = vmatmul.mubr.msk.bf16.gmra.mrb[16].mxu1 %vm347_vm14, %v694_v7  ;;  %1426 = vmatprep.mubr.msk.bf16.mxu0 %vm347_vm14, %v326_v6 }
 0x13b   :  { %v327_v8 = vpop.trf.xlu0  ;;  %v695_v50 = vpop.trf.xlu1 }
 0x13c   :  { %1427 = vmatmul.mubr.msk.bf16.gmra.mrb[20].mxu0 %vm347_vm14, %v327_v8  ;;  %1464 = vmatprep.mubr.msk.bf16.mxu1 %vm347_vm14, %v695_v50 }
 0x13f   :  { %v328_v9 = vpop.trf.xlu0  ;;  %v696_v16 = vpop.trf.xlu1 }
 0x140   :  { %1465 = vmatmul.mubr.msk.bf16.gmra.mrb[20].mxu1 %vm347_vm14, %v696_v16  ;;  %1430 = vmatprep.mubr.msk.bf16.mxu0 %vm347_vm14, %v328_v9 }
 0x143   :  { %v329_v10 = vpop.trf.xlu0  ;;  %v697_v12 = vpop.trf.xlu1 }
 0x144   :  { %1431 = vmatmul.mubr.msk.bf16.gmra.mrb[24].mxu0 %vm347_vm14, %v329_v10  ;;  %1468 = vmatprep.mubr.msk.bf16.mxu1 %vm347_vm14, %v697_v12 }
 0x147   :  { %v330_v20 = vpop.trf.xlu0  ;;  %v698_v29 = vpop.trf.xlu1 }
 0x148   :  { %1469 = vmatmul.mubr.msk.bf16.gmra.mrb[24].mxu1 %vm347_vm14, %v698_v29  ;;  %1434 = vmatprep.mubr.msk.bf16.mxu0 %vm347_vm14, %v330_v20 }
 0x14b   :  { %v331_v25 = vpop.trf.xlu0  ;;  %v699_v2 = vpop.trf.xlu1 }
 0x14c   :  { %1435 = vmatmul.mubr.msk.bf16.gmra.mrb[28].mxu0 %vm347_vm14, %v331_v25  ;;  %1472 = vmatprep.mubr.msk.bf16.mxu1 %vm347_vm14, %v699_v2 }
 0x14d   :  { %1492 = vmatprep.mubr.msk.bf16.mxu0 %vm1657_vm15, %v1656_v17 }
 0x14f   :  { %v700_v23 = vpop.trf.xlu1 }
 0x150   :  { %1473 = vmatmul.mubr.msk.bf16.gmra.mrb[28].mxu1 %vm347_vm14, %v700_v23 }
 0x151   :  { %1512 = vmatprep.mubr.msk.bf16.mxu1 %vm1657_vm15, %v1656_v17 }
 0x1e7   :  { %v1408_v28 = vpop.f32.mrb[0].mxu0 }
 0x1e8   :  { %v434_v33 = vpop.f32.mrb[1].mxu0  ;;  %v443_v34 = vadd.f32 %v1408_v28, %v2019_v26 }
 0x1e9   :  { %v435_v35 = vadd.f32 %v2019_v26, %v434_v33  ;;  %v1409_v19 = vpop.f32.mrb[2].mxu0 }
 0x1ea   :  { %v437_v37 = vpop.f32.mrb[3].mxu0  ;;  %v446_v0 = vadd.f32 %v1409_v19, %v2019_v26  ;;  %v563_v40 = vmax.f32 %v443_v34, 0.0 }
 0x1eb   :  { %v561_v22 = vmax.f32 %v435_v35, 0.0  ;;  %v438_v15 = vadd.f32 %v2019_v26, %v437_v37  ;;  %v1446_v38 = vpop.f32.mrb[0].mxu1 }
 0x1ec   :  { %v783_v39 = vpop.f32.mrb[1].mxu1  ;;  %v792_v18 = vadd.f32 %v1446_v38, %v2019_v26  ;;  %v564_v3 = vmax.f32 %v446_v0, 0.0 }
 0x1ed   :  { %v562_v62 = vmax.f32 %v438_v15, 0.0  ;;  %v784_v42 = vadd.f32 %v2019_v26, %v783_v39  ;;  %v1447_v43 = vpop.f32.mrb[2].mxu1 }
 0x1ee   :  { %v786_v36 = vpop.f32.mrb[3].mxu1  ;;  %v795_v48 = vadd.f32 %v1447_v43, %v2019_v26  ;;  %v912_v11 = vmax.f32 %v792_v18, 0.0 }
 0x1ef   :  { %v593_v45 = vadd.f32 %v562_v62, %v561_v22  ;;  %v787_v46 = vadd.f32 %v2019_v26, %v786_v36  ;;  %v1412_v47 = vpop.f32.mrb[4].mxu0  ;;  %v910_v51 = vmax.f32 %v784_v42, 0.0 }
 0x1f0   :  { %v459_v49 = vadd.f32 %v1412_v47, %v2019_v26  ;;  %v450_v44 = vpop.f32.mrb[5].mxu0  ;;  %v913_v61 = vmax.f32 %v795_v48, 0.0 }
 0x1f1   :  { %v594_v1 = vadd.f32 %v593_v45, %v563_v40  ;;  %v911_v4 = vmax.f32 %v787_v46, 0.0  ;;  %v451_v52 = vadd.f32 %v2019_v26, %v450_v44  ;;  %v1413_v53 = vpop.f32.mrb[6].mxu0 }
 0x1f2   :  { %v453_v54 = vpop.f32.mrb[7].mxu0  ;;  %v567_v63 = vmax.f32 %v459_v49, 0.0  ;;  %v462_v5 = vadd.f32 %v1413_v53, %v2019_v26 }
 0x1f3   :  { %v942_v56 = vadd.f32 %v911_v4, %v910_v51  ;;  %v565_v21 = vmax.f32 %v451_v52, 0.0  ;;  %v595_v57 = vadd.f32 %v594_v1, %v564_v3  ;;  %v454_v59 = vadd.f32 %v2019_v26, %v453_v54  ;;  %v1450_v60 = vpop.f32.mrb[4].mxu1 }
 0x1f4   :  { %v799_v14 = vpop.f32.mrb[5].mxu1  ;;  %v808_v16 = vadd.f32 %v1450_v60, %v2019_v26  ;;  %v568_v23 = vmax.f32 %v462_v5, 0.0 }
 0x1f5   :  { %v943_v6 = vadd.f32 %v942_v56, %v912_v11  ;;  %v596_v7 = vadd.f32 %v595_v57, %v565_v21  ;;  %v566_v8 = vmax.f32 %v454_v59, 0.0  ;;  %v800_v50 = vadd.f32 %v2019_v26, %v799_v14  ;;  %v1451_v9 = vpop.f32.mrb[6].mxu1 }
 0x1f6   :  { %v802_v10 = vpop.f32.mrb[7].mxu1  ;;  %v811_v24 = vadd.f32 %v1451_v9, %v2019_v26  ;;  %v916_v32 = vmax.f32 %v808_v16, 0.0 }
 0x1f7   :  { %v597_v12 = vadd.f32 %v596_v7, %v566_v8  ;;  %v914_v20 = vmax.f32 %v800_v50, 0.0  ;;  %v944_v29 = vadd.f32 %v943_v6, %v913_v61  ;;  %v803_v25 = vadd.f32 %v2019_v26, %v802_v10  ;;  %v1416_v2 = vpop.f32.mrb[8].mxu0 }
 0x1f8   :  { %v475_v13 = vadd.f32 %v1416_v2, %v2019_v26  ;;  %v466_v27 = vpop.f32.mrb[9].mxu0  ;;  %v917_v22 = vmax.f32 %v811_v24, 0.0 }
 0x1f9   :  { %v598_v41 = vadd.f32 %v597_v12, %v567_v63  ;;  %v945_v58 = vadd.f32 %v944_v29, %v914_v20  ;;  %v915_v30 = vmax.f32 %v803_v25, 0.0  ;;  %v467_v31 = vadd.f32 %v2019_v26, %v466_v27  ;;  %v1417_v55 = vpop.f32.mrb[10].mxu0 }
 0x1fa   :  { %v469_v28 = vpop.f32.mrb[11].mxu0  ;;  %v571_v15 = vmax.f32 %v475_v13, 0.0  ;;  %v478_v38 = vadd.f32 %v1417_v55, %v2019_v26 }
 0x1fb   :  { %v946_v33 = vadd.f32 %v945_v58, %v915_v30  ;;  %v569_v34 = vmax.f32 %v467_v31, 0.0  ;;  %v599_v35 = vadd.f32 %v598_v41, %v568_v23  ;;  %v470_v19 = vadd.f32 %v2019_v26, %v469_v28  ;;  %v1454_v37 = vpop.f32.mrb[8].mxu1 }
 0x1fc   :  { %v815_v0 = vpop.f32.mrb[9].mxu1  ;;  %v824_v18 = vadd.f32 %v1454_v37, %v2019_v26  ;;  %v572_v49 = vmax.f32 %v478_v38, 0.0 }
 0x1fd   :  { %v947_v39 = vadd.f32 %v946_v33, %v916_v32  ;;  %v600_v40 = vadd.f32 %v599_v35, %v569_v34  ;;  %v570_v62 = vmax.f32 %v470_v19, 0.0  ;;  %v816_v42 = vadd.f32 %v2019_v26, %v815_v0  ;;  %v1455_v43 = vpop.f32.mrb[10].mxu1 }
 0x1fe   :  { %v818_v36 = vpop.f32.mrb[11].mxu1  ;;  %v827_v44 = vadd.f32 %v1455_v43, %v2019_v26  ;;  %v920_v56 = vmax.f32 %v824_v18, 0.0 }
 0x1ff   :  { %v601_v45 = vadd.f32 %v600_v40, %v570_v62  ;;  %v918_v46 = vmax.f32 %v816_v42, 0.0  ;;  %v948_v47 = vadd.f32 %v947_v39, %v917_v22  ;;  %v819_v3 = vadd.f32 %v2019_v26, %v818_v36  ;;  %v1420_v48 = vpop.f32.mrb[12].mxu0 }
 0x200   :  { %v491_v1 = vadd.f32 %v1420_v48, %v2019_v26  ;;  %v482_v51 = vpop.f32.mrb[13].mxu0  ;;  %v921_v5 = vmax.f32 %v827_v44, 0.0 }
 0x201   :  { %v602_v4 = vadd.f32 %v601_v45, %v571_v15  ;;  %v949_v52 = vadd.f32 %v948_v47, %v918_v46  ;;  %v919_v53 = vmax.f32 %v819_v3, 0.0  ;;  %v483_v11 = vadd.f32 %v2019_v26, %v482_v51  ;;  %v1421_v54 = vpop.f32.mrb[14].mxu0 }
 0x202   :  { %v485_v21 = vpop.f32.mrb[15].mxu0  ;;  %v575_v14 = vmax.f32 %v491_v1, 0.0  ;;  %v494_v6 = vadd.f32 %v1421_v54, %v2019_v26 }
 0x203   :  { %v950_v57 = vadd.f32 %v949_v52, %v919_v53  ;;  %v573_v59 = vmax.f32 %v483_v11, 0.0  ;;  %v603_v60 = vadd.f32 %v602_v4, %v572_v49  ;;  %v486_v61 = vadd.f32 %v2019_v26, %v485_v21  ;;  %v1458_v63 = vpop.f32.mrb[12].mxu1 }
 0x204   :  { %v831_v7 = vpop.f32.mrb[13].mxu1  ;;  %v840_v12 = vadd.f32 %v1458_v63, %v2019_v26  ;;  %v576_v13 = vmax.f32 %v494_v6, 0.0 }
 0x205   :  { %v951_v8 = vadd.f32 %v950_v57, %v920_v56  ;;  %v604_v50 = vadd.f32 %v603_v60, %v573_v59  ;;  %v574_v9 = vmax.f32 %v486_v61, 0.0  ;;  %v832_v16 = vadd.f32 %v2019_v26, %v831_v7  ;;  %v1459_v10 = vpop.f32.mrb[14].mxu1 }
 0x206   :  { %v834_v20 = vpop.f32.mrb[15].mxu1  ;;  %v843_v27 = vadd.f32 %v1459_v10, %v2019_v26  ;;  %v924_v33 = vmax.f32 %v840_v12, 0.0 }
 0x207   :  { %v605_v29 = vadd.f32 %v604_v50, %v574_v9  ;;  %v922_v25 = vmax.f32 %v832_v16, 0.0  ;;  %v952_v2 = vadd.f32 %v951_v8, %v921_v5  ;;  %v835_v23 = vadd.f32 %v2019_v26, %v834_v20  ;;  %v1424_v24 = vpop.f32.mrb[16].mxu0 }
 0x208   :  { %v507_v41 = vadd.f32 %v1424_v24, %v2019_v26  ;;  %v498_v58 = vpop.f32.mrb[17].mxu0  ;;  %v925_v38 = vmax.f32 %v843_v27, 0.0 }
 0x209   :  { %v606_v30 = vadd.f32 %v605_v29, %v575_v14  ;;  %v953_v31 = vadd.f32 %v952_v2, %v922_v25  ;;  %v923_v55 = vmax.f32 %v835_v23, 0.0  ;;  %v499_v32 = vadd.f32 %v2019_v26, %v498_v58  ;;  %v1425_v28 = vpop.f32.mrb[18].mxu0 }
 0x20a   :  { %v501_v34 = vpop.f32.mrb[19].mxu0  ;;  %v579_v0 = vmax.f32 %v507_v41, 0.0  ;;  %v510_v39 = vadd.f32 %v1425_v28, %v2019_v26 }
 0x20b   :  { %v954_v35 = vadd.f32 %v953_v31, %v923_v55  ;;  %v577_v19 = vmax.f32 %v499_v32, 0.0  ;;  %v607_v37 = vadd.f32 %v606_v30, %v576_v13  ;;  %v502_v22 = vadd.f32 %v2019_v26, %v501_v34  ;;  %v1462_v15 = vpop.f32.mrb[16].mxu1 }
 0x20c   :  { %v847_v40 = vpop.f32.mrb[17].mxu1  ;;  %v856_v45 = vadd.f32 %v1462_v15, %v2019_v26  ;;  %v580_v1 = vmax.f32 %v510_v39, 0.0 }
 0x20d   :  { %v955_v62 = vadd.f32 %v954_v35, %v924_v33  ;;  %v608_v42 = vadd.f32 %v607_v37, %v577_v19  ;;  %v578_v43 = vmax.f32 %v502_v22, 0.0  ;;  %v848_v18 = vadd.f32 %v2019_v26, %v847_v40  ;;  %v1463_v36 = vpop.f32.mrb[18].mxu1 }
 0x20e   :  { %v850_v46 = vpop.f32.mrb[19].mxu1  ;;  %v859_v51 = vadd.f32 %v1463_v36, %v2019_v26  ;;  %v928_v57 = vmax.f32 %v856_v45, 0.0 }
 0x20f   :  { %v609_v47 = vadd.f32 %v608_v42, %v578_v43  ;;  %v926_v3 = vmax.f32 %v848_v18, 0.0  ;;  %v956_v48 = vadd.f32 %v955_v62, %v925_v38  ;;  %v851_v49 = vadd.f32 %v2019_v26, %v850_v46  ;;  %v1428_v44 = vpop.f32.mrb[20].mxu0 }
 0x210   :  { %v523_v4 = vadd.f32 %v1428_v44, %v2019_v26  ;;  %v514_v52 = vpop.f32.mrb[21].mxu0  ;;  %v929_v6 = vmax.f32 %v859_v51, 0.0 }
 0x211   :  { %v610_v53 = vadd.f32 %v609_v47, %v579_v0  ;;  %v957_v11 = vadd.f32 %v956_v48, %v926_v3  ;;  %v927_v54 = vmax.f32 %v851_v49, 0.0  ;;  %v515_v56 = vadd.f32 %v2019_v26, %v514_v52  ;;  %v1429_v21 = vpop.f32.mrb[22].mxu0 }
 0x212   :  { %v517_v59 = vpop.f32.mrb[23].mxu0  ;;  %v583_v7 = vmax.f32 %v523_v4, 0.0  ;;  %v526_v8 = vadd.f32 %v1429_v21, %v2019_v26 }
 0x213   :  { %v958_v60 = vadd.f32 %v957_v11, %v927_v54  ;;  %v581_v61 = vmax.f32 %v515_v56, 0.0  ;;  %v611_v63 = vadd.f32 %v610_v53, %v580_v1  ;;  %v518_v5 = vadd.f32 %v2019_v26, %v517_v59  ;;  %v1466_v14 = vpop.f32.mrb[20].mxu1 }
 0x214   :  { %v863_v50 = vpop.f32.mrb[21].mxu1  ;;  %v872_v29 = vadd.f32 %v1466_v14, %v2019_v26  ;;  %v584_v41 = vmax.f32 %v526_v8, 0.0 }
 0x215   :  { %v959_v9 = vadd.f32 %v958_v60, %v928_v57  ;;  %v612_v16 = vadd.f32 %v611_v63, %v581_v61  ;;  %v582_v10 = vmax.f32 %v518_v5, 0.0  ;;  %v864_v12 = vadd.f32 %v2019_v26, %v863_v50  ;;  %v1467_v20 = vpop.f32.mrb[22].mxu1 }
 0x216   :  { %v866_v25 = vpop.f32.mrb[23].mxu1  ;;  %v875_v58 = vadd.f32 %v1467_v20, %v2019_v26  ;;  %v932_v35 = vmax.f32 %v872_v29, 0.0 }
 0x217   :  { %v613_v2 = vadd.f32 %v612_v16, %v582_v10  ;;  %v930_v23 = vmax.f32 %v864_v12, 0.0  ;;  %v960_v24 = vadd.f32 %v959_v9, %v929_v6  ;;  %v867_v13 = vadd.f32 %v2019_v26, %v866_v25  ;;  %v1432_v27 = vpop.f32.mrb[24].mxu0 }
 0x218   :  { %v539_v30 = vadd.f32 %v1432_v27, %v2019_v26  ;;  %v530_v31 = vpop.f32.mrb[25].mxu0  ;;  %v933_v39 = vmax.f32 %v875_v58, 0.0 }
 0x219   :  { %v614_v55 = vadd.f32 %v613_v2, %v583_v7  ;;  %v961_v32 = vadd.f32 %v960_v24, %v930_v23  ;;  %v931_v28 = vmax.f32 %v867_v13, 0.0  ;;  %v531_v33 = vadd.f32 %v2019_v26, %v530_v31  ;;  %v1433_v34 = vpop.f32.mrb[26].mxu0 }
 0x21a   :  { %v533_v19 = vpop.f32.mrb[27].mxu0  ;;  %v587_v40 = vmax.f32 %v539_v30, 0.0  ;;  %v542_v62 = vadd.f32 %v1433_v34, %v2019_v26 }
 0x21b   :  { %v962_v37 = vadd.f32 %v961_v32, %v931_v28  ;;  %v585_v22 = vmax.f32 %v531_v33, 0.0  ;;  %v615_v15 = vadd.f32 %v614_v55, %v584_v41  ;;  %v534_v38 = vadd.f32 %v2019_v26, %v533_v19  ;;  %v1470_v0 = vpop.f32.mrb[24].mxu1 }
 0x21c   :  { %v879_v42 = vpop.f32.mrb[25].mxu1  ;;  %v888_v47 = vadd.f32 %v1470_v0, %v2019_v26  ;;  %v588_v4 = vmax.f32 %v542_v62, 0.0 }
 0x21d   :  { %v963_v43 = vadd.f32 %v962_v37, %v932_v35  ;;  %v616_v18 = vadd.f32 %v615_v15, %v585_v22  ;;  %v586_v36 = vmax.f32 %v534_v38, 0.0  ;;  %v880_v45 = vadd.f32 %v2019_v26, %v879_v42  ;;  %v1471_v46 = vpop.f32.mrb[26].mxu1 }
 0x21e   :  { %v882_v3 = vpop.f32.mrb[27].mxu1  ;;  %v891_v52 = vadd.f32 %v1471_v46, %v2019_v26  ;;  %v936_v60 = vmax.f32 %v888_v47, 0.0 }
 0x21f   :  { %v617_v48 = vadd.f32 %v616_v18, %v586_v36  ;;  %v934_v49 = vmax.f32 %v880_v45, 0.0  ;;  %v964_v44 = vadd.f32 %v963_v43, %v933_v39  ;;  %v883_v1 = vadd.f32 %v2019_v26, %v882_v3  ;;  %v1436_v51 = vpop.f32.mrb[28].mxu0 }
 0x220   :  { %v555_v53 = vadd.f32 %v1436_v51, %v2019_v26  ;;  %v546_v11 = vpop.f32.mrb[29].mxu0  ;;  %v937_v8 = vmax.f32 %v891_v52, 0.0  ;;  %v1569_v51 = vld [vmem:[%s2154_s7 + $0x20] sm:$0xff]   ;;  %v1571_v52 = vld [vmem:[%s2154_s7 + $0x30] sm:$0xff]  }
 0x221   :  { %v618_v54 = vadd.f32 %v617_v48, %v587_v40  ;;  %v965_v56 = vadd.f32 %v964_v44, %v934_v49  ;;  %v935_v21 = vmax.f32 %v883_v1, 0.0  ;;  %v547_v57 = vadd.f32 %v2019_v26, %v546_v11  ;;  %v1437_v59 = vpop.f32.mrb[30].mxu0  ;;  %v1566_v49 = vld [vmem:[%s2154_s7 + $0x8] sm:$0xff]   ;;  %v1567_v44 = vld [vmem:[%s2154_s7 + $0x10] sm:$0xff]   ;;  %v1568_v1 = vld [vmem:[%s2154_s7 + $0x18] sm:$0xff]  }
 0x222   :  { %v549_v61 = vpop.f32.mrb[31].mxu0  ;;  %v591_v50 = vmax.f32 %v555_v53, 0.0  ;;  %v558_v9 = vadd.f32 %v1437_v59, %v2019_v26  ;;  %1499 = vmatpush3.bf16.msra.mxu1 %v1566_v49  ;;  %v1572_v53 = vld [vmem:[%s2154_s7 + $0x38] sm:$0xff]   ;;  %v1324_v11 = vld [vmem:[%s2151_s4] ss:$0 sm:$0xff] }
 0x223   :  { %v966_v63 = vadd.f32 %v965_v56, %v935_v21  ;;  %v589_v5 = vmax.f32 %v547_v57, 0.0  ;;  %v619_v14 = vadd.f32 %v618_v54, %v588_v4  ;;  %v550_v6 = vadd.f32 %v2019_v26, %v549_v61  ;;  %v1474_v7 = vpop.f32.mrb[28].mxu1  ;;  %1500 = vmatprep.subr.bf16.mxu1 %v1656_v17  ;;  %v1570_v4 = vld [vmem:[%s2154_s7 + $0x28] sm:$0xff]  }
 0x224   :  { %v895_v16 = vpop.f32.mrb[29].mxu1  ;;  %v904_v2 = vadd.f32 %v1474_v7, %v2019_v26  ;;  %v592_v58 = vmax.f32 %v558_v9, 0.0 }
 0x225   :  { %v967_v10 = vadd.f32 %v966_v63, %v936_v60  ;;  %v620_v12 = vadd.f32 %v619_v14, %v589_v5  ;;  %v590_v20 = vmax.f32 %v550_v6, 0.0  ;;  %v896_v29 = vadd.f32 %v2019_v26, %v895_v16  ;;  %v1475_v25 = vpop.f32.mrb[30].mxu1 }
 0x226   :  { %v898_v23 = vpop.f32.mrb[31].mxu1  ;;  %v907_v55 = vadd.f32 %v1475_v25, %v2019_v26  ;;  %v940_v33 = vmax.f32 %v904_v2, 0.0  ;;  %1501 = vmatpush3.bf16.msra.mxu1 %v1567_v44 }
 0x227   :  { %v621_v24 = vadd.f32 %v620_v12, %v590_v20  ;;  %v938_v13 = vmax.f32 %v896_v29, 0.0  ;;  %v968_v27 = vadd.f32 %v967_v10, %v937_v8  ;;  %v899_v41 = vadd.f32 %v2019_v26, %v898_v23  ;;  %1502 = vmatprep.subr.bf16.mxu1 %v1656_v17 }
 0x228   :  { %v941_v19 = vmax.f32 %v907_v55, 0.0 }
 0x229   :  { %v622_v30 = vadd.f32 %v621_v24, %v591_v50  ;;  %v969_v31 = vadd.f32 %v968_v27, %v938_v13  ;;  %v939_v32 = vmax.f32 %v899_v41, 0.0  ;;  %v1333_v13 = vld [vmem:[%s2152_s5] ss:$0 sm:$0xff]  ;;  %v1334_v41 = vld [vmem:[#allocation3] ss:$0 sm:$0xff] }
 0x22a   :  { %1503 = vmatpush3.bf16.msra.mxu1 %v1568_v1 }
 0x22b   :  { %v623_v28 = vadd.f32 %v622_v30, %v592_v58  ;;  %v970_v34 = vadd.f32 %v969_v31, %v939_v32  ;;  %1504 = vmatprep.subr.bf16.mxu1 %v1656_v17 }
 0x22d   :  { %v624_v35 = vrot.slane %v623_v28, 4  ;;  %v971_v37 = vadd.f32 %v970_v34, %v940_v33 }
 0x22e   :  { %1505 = vmatpush3.bf16.msra.mxu1 %v1569_v51 }
 0x22f   :  { %v625_v22 = vadd.f32 %v624_v35, %v623_v28  ;;  %v972_v15 = vadd.f32 %v971_v37, %v941_v19  ;;  %1506 = vmatprep.subr.bf16.mxu1 %v1656_v17 }
 0x231   :  { %v626_v38 = vrot.slane %v625_v22, 2  ;;  %v973_v0 = vrot.slane %v972_v15, 4 }
 0x232   :  { %1507 = vmatpush3.bf16.msra.mxu1 %v1570_v4 }
 0x233   :  { %v627_v39 = vadd.f32 %v626_v38, %v625_v22  ;;  %v974_v40 = vadd.f32 %v973_v0, %v972_v15  ;;  %1508 = vmatprep.subr.bf16.mxu1 %v1656_v17 }
 0x235   :  { %v628_v62 = vrot.slane %v627_v39, 1  ;;  %v975_v42 = vrot.slane %v974_v40, 2 }
 0x236   :  { %1509 = vmatpush3.bf16.msra.mxu1 %v1571_v52 }
 0x237   :  { %v976_v43 = vadd.f32 %v975_v42, %v974_v40  ;;  %v629_v18 = vadd.f32 %v628_v62, %v627_v39  ;;  %1510 = vmatprep.subr.bf16.mxu1 %v1656_v17 }
 0x239   :  { %v977_v36 = vrot.slane %v976_v43, 1  ;;  %v631_v26 = vmul.f32 0.00390625, %v629_v18 }
 0x23a   :  { %1511 = vmatpush3.bf16.msra.mxu1 %v1572_v53 }
 0x23b   :  { %v978_v45 = vadd.f32 %v977_v36, %v976_v43 }
 0x23d   :  { %v979_v46 = vmul.f32 0.00390625, %v978_v45 }
 0x23f   :  { %v981_v47 = vsel %vm980_vm0, %v631_v26, %v979_v46 }
 0x240   :  { %984 = vst [vmem:[#allocation2] sm:$0x3] %v981_v47 }
 0x247   :  { %v989_v3 = vld [vmem:[#allocation2] sm:$0x3] }
 0x248   :  { %v991_v48 = vpack.c.bf16 %v989_v3, %v989_v3  ;;  %990 = vst [vmem:[#allocation6] sm:$0x3] %v989_v3 }
 0x24a   :  { %1493 = vmatmul.mubr.bf16.vlgmr.msra.gmra.mrb[32].mxu0 %v991_v48 }
 0x31d   :  { %v1097_v54 = vpop.f32.mrb[32].mxu0 }
 0x31e   :  { %v1098_v56 = vadd.f32 %v1324_v11, %v1097_v54  ;;  %v1494_v21 = vpop.f32.mrb[33].mxu0 }
 0x31f   :  { %v1100_v57 = vpop.f32.mrb[34].mxu0 }
 0x320   :  { %v1103_v59 = vsel %vm396_vm6, %v1098_v56, 0.0  ;;  %v1495_v60 = vpop.f32.mrb[35].mxu0 }
 0x321   :  { %v1104_v61 = vrot.slane %v1103_v59, 4 }
 0x323   :  { %v1105_v63 = vadd.f32 %v1104_v61, %v1103_v59 }
 0x325   :  { %v1106_v5 = vrot.slane %v1105_v63, 2 }
 0x327   :  { %v1107_v17 = vadd.f32 %v1106_v5, %v1105_v63 }
 0x329   :  { %v1108_v14 = vrot.slane %v1107_v17, 1 }
 0x32b   :  { %v1109_v6 = vadd.f32 %v1108_v14, %v1107_v17 }
 0x32d   :  { %v1111_v7 = vmul.f32 0.5, %v1109_v6 }
 0x32f   :  { %v1112_v8 = vsub.f32 %v1098_v56, %v1111_v7 }
 0x331   :  { %v1113_v50 = vmul.f32 %v1112_v8, %v1112_v8 }
 0x333   :  { %v1114_v9 = vsel %vm396_vm6, %v1113_v50, 0.0 }
 0x334   :  { %v1115_v16 = vrot.slane %v1114_v9, 4 }
 0x336   :  { %v1116_v10 = vadd.f32 %v1115_v16, %v1114_v9 }
 0x338   :  { %v1117_v12 = vrot.slane %v1116_v10, 2 }
 0x33a   :  { %v1118_v20 = vadd.f32 %v1117_v12, %v1116_v10 }
 0x33c   :  { %v1119_v29 = vrot.slane %v1118_v20, 1 }
 0x33e   :  { %v1120_v25 = vadd.f32 %v1119_v29, %v1118_v20 }
 0x340   :  { %v1121_v2 = vmul.f32 0.5, %v1120_v25 }
 0x342   :  { %v1122_v23 = vadd.f32 1e-05, %v1121_v2 }
 0x344   :  { %1573 = vrsqrt.f32 %v1122_v23 }
 0x34e   :  { %v1574_v24 = vpop.eup %1573 }
 0x34f   :  { %v1124_v27 = vmul.f32 %v1574_v24, %v1112_v8 }
 0x351   :  { %v1132_v58 = vmul.f32 %v1333_v13, %v1124_v27 }
 0x353   :  { %v1140_v30 = vadd.f32 %v1334_v41, %v1132_v58 }
 0x355   :  { %v1141_v31 = vmax.f32 %v1140_v30, 0.0 }
 0x357   :  { %v1142_v55 = vpack.c.bf16 %v1141_v31, %v1141_v31 }
 0x359   :  { %1513 = vmatmul.mubr.bf16.vlgmr.msra.gmra.mrb[32].mxu1 %v1142_v55 }
 0x35a   :  { %1608 = shalt.err (!%p1605_p12)
}
 0x35b   :  { %s1609_s5 = scalar_lea.hbm %s2156_s9, 32 }
 0x35c   :  { %p1610_p13 = scmp.ne.s32.totalorder %s2156_s9, %s1609_s5  ;;  %p1613_p0 = scmp.lt.u32.totalorder %s1609_s5, %s2156_s9 }
 0x35e   :  { %p1615_p1 = pnand %p1613_p0, %p1610_p13 }
 0x360   :  { %1618 = shalt.err (!%p1615_p1)
}
 0x361   :  { %1264 = dma.vmem_to_hbm [thread:$0]  %s1262_s0, 32, %s2156_s9, [#allocation5]   ;;  %v1335_v32 = vld [vmem:[%s2155_s8] ss:$0 sm:$0xff] }
 0x362   :  { %s1659_s21 = smov [#allocation7]  }
 0x363   :  { %s1271_s1 = sshll.u32 %s1659_s21, 4  ;;  %s1272_s1 = int_to_ptr.vmem [resolvable:$true] %s1271_s1 }
 0x364   :  { %s1619_s22 = scalar_lea.vmem %s1272_s1, 32  ;;  %p1624_p3 = scmp.lt.s32.totalorder %s1272_s1, %s1272_s1 }
 0x365   :  { %p1620_p2 = scmp.ne.s32.totalorder %s1272_s1, %s1619_s22  ;;  %p1625_p4 = scmp.lt.s32.totalorder %s1619_s22, %s1619_s22 }
 0x367   :  { %p1626_p5 = por %p1625_p4, %p1624_p3 }
 0x369   :  { %p1627_p6 = pnand %p1626_p5, %p1620_p2 }
 0x42c   :  { %v1248_v28 = vpop.f32.mrb[32].mxu1 }
 0x42d   :  { %v1249_v33 = vadd.f32 %v1335_v32, %v1248_v28  ;;  %v1514_v34 = vpop.f32.mrb[33].mxu1 }
 0x42e   :  { %v1251_v35 = vpop.f32.mrb[34].mxu1 }
 0x42f   :  { %1254 = vst [vmem:[#allocation7] sm:$0x3] %v1249_v33  ;;  %v1515_v19 = vpop.f32.mrb[35].mxu1 }
 0x430   :  { %1630 = shalt.err (!%p1627_p6)
}
 0x431   :  { %s1631_s8 = scalar_lea.hbm %s2157_s10, 32 }
 0x432   :  { %p1632_p7 = scmp.ne.s32.totalorder %s2157_s10, %s1631_s8  ;;  %p1635_p8 = scmp.lt.u32.totalorder %s1631_s8, %s2157_s10 }
 0x434   :  { %p1637_p9 = pnand %p1635_p8, %p1632_p7 }
 0x436   :  { %1640 = shalt.err (!%p1637_p9)
}
 0x437   :  { %1274 = dma.vmem_to_hbm [thread:$0]  %s1272_s1, 32, %s2157_s10, [#allocation8]  }
 0x438   :  { %1643 = dma.done.wait [#allocation5], 32  }
 0x439   :  { %1644 = vsyncadd [#allocation5], 4294967264 }
 0x43a   :  { %1645 = dma.done.wait [#allocation8], 32  }
 0x43b   :  { %1646 = vsyncadd [#allocation8], 4294967264 }
 0x43c   :  { %1281 = vsyncpa [#allocation4], 1 }
 0x43d   :  { %1282 = vsyncpa [#allocation5], 1 }
 0x43e   :  { %1283 = vsyncpa [#allocation8], 1 }

</bundles_post_ra>
